<compile_context>
chip_gen: v6e
topology: v6e:2x2x1
jax: 0.10.0
libtpu: 0.0.40
codegen_flags: <defaults>
</compile_context>

<pallas_src>
import functools

import jax
import jax.numpy as jnp
from jax import lax
from jax.experimental import pallas as pl
from jax.experimental.pallas import tpu as pltpu

KERNEL = 4
STRIDE = 2
PAD = 1


def _round_up(x, m):
    return ((x + m - 1) // m) * m


def _conv_s2d_kernel(ym_ref, yh_ref, w_ref, b_ref, o_ref, ybuf, *, t_od, s_pad, wq):
    """One (sample, depth-tile) step of the fused stride-2 / kernel-4 conv.

    ym_ref : (t_od*s_pad, 8C) bf16  s2d rows for output depths [i*t_od, (i+1)*t_od)
    yh_ref : (s_pad, 8C)      bf16  s2d rows for depth (i+1)*t_od (halo slice)
    w_ref  : (8, 8C, Cout)    bf16  per-(gd,gh,gw) weight matrices (VMEM resident)
    b_ref  : (1, Cout)        f32   bias
    o_ref  : (t_od*s_pad, Cout) f32 rows indexed like the input; junk rows dropped outside
    ybuf   : scratch (t_od*s_pad + s_pad + wq + 1, 8C) bf16
    """
    r = t_od * s_pad
    c8 = ym_ref.shape[-1]

    # Assemble the depth window: main tile + one halo slice + a small zero tail so
    # the contiguous offset windows below never read outside the buffer (the tail
    # only feeds junk output rows that are sliced away in the wrapper).
    ybuf[0:r, :] = ym_ref[...]
    ybuf[r:r + s_pad, :] = yh_ref[...]
    ybuf[r + s_pad:r + s_pad + wq + 1, :] = jnp.zeros((wq + 1, c8), dtype=ybuf.dtype)

    # Bias folded into the accumulator init; accumulate directly into the f32 output
    # block (no separate accumulator scratch).
    o_ref[...] = jnp.broadcast_to(b_ref[...], o_ref.shape)

    # 8 offset-GEMMs == stride-1 2x2x2 conv over the space-to-depth input.
    for gd in range(2):
        for gh in range(2):
            for gw in range(2):
                g = (gd * 2 + gh) * 2 + gw
                off = gd * s_pad + gh * wq + gw
                o_ref[...] += jnp.dot(
                    ybuf[off:off + r, :], w_ref[g],
                    preferred_element_type=jnp.float32,
                )


def downsample_block(x, w, b, *, vmem_target_bytes=20 << 20):
    """x: [N, C, D, H, W] (NCDHW), w: [C, C, 4, 4, 4], b: [C] -> [N, C, D/2, H/2, W/2]."""
    N, Cin, D, H, W = x.shape
    Cout = w.shape[0]

    Do = (D + 2 * PAD - KERNEL) // STRIDE + 1
    Ho = (H + 2 * PAD - KERNEL) // STRIDE + 1
    Wo = (W + 2 * PAD - KERNEL) // STRIDE + 1

    # Space-to-depth grid (one halo slice past the output extent in every dim).
    Dq, Hq, Wq = Do + 1, Ho + 1, Wo + 1
    C8 = 8 * Cin
    # Flattened (h, w) rows per depth slice, padded to a multiple of 16 so every
    # block's sublane dim is bf16/f32 tile friendly for any depth-tile size.
    S_pad = _round_up(Hq * Wq, 16)

    # ---- wrapper-side layout plumbing (pure permutation, no 8x im2col blow-up) ----
    pd = 2 * Dq - (D + PAD)   # high-side pads (== PAD for even dims)
    ph = 2 * Hq - (H + PAD)
    pw = 2 * Wq - (W + PAD)
    xq = jnp.pad(x.astype(jnp.bfloat16),
                 ((0, 0), (0, 0), (PAD, pd), (PAD, ph), (PAD, pw)))
    xq = xq.reshape(N, Cin, Dq, 2, Hq, 2, Wq, 2)
    xq = jnp.transpose(xq, (0, 2, 4, 6, 3, 5, 7, 1))     # N, Dq, Hq, Wq, rd, rh, rw, C
    ys = xq.reshape(N, Dq, Hq * Wq, C8)
    ys = jnp.pad(ys, ((0, 0), (0, 0), (0, S_pad - Hq * Wq), (0, 0)))
    ys = ys.reshape(N, Dq * S_pad, C8)

    # Weights -> 8 per-offset [8C, Cout] matrices (channel order matches s2d packing).
    wt = jnp.transpose(w, (2, 3, 4, 1, 0))                # kd, kh, kw, ci, co
    wt = wt.reshape(2, 2, 2, 2, 2, 2, Cin, Cout)          # gd, rd, gh, rh, gw, rw, ci, co
    wt = jnp.transpose(wt, (0, 2, 4, 1, 3, 5, 6, 7))      # gd, gh, gw, rd, rh, rw, ci, co
    wg = wt.reshape(8, C8, Cout).astype(jnp.bfloat16)
    b2 = b.astype(jnp.float32).reshape(1, Cout)

    # ---- depth-tile size: largest divisor of Do that fits a conservative VMEM budget
    def _vmem_bytes(t_od):
        r = t_od * S_pad
        return (2 * r * C8 * 2                 # y_main block (double-buffered)
                + 2 * S_pad * C8 * 2           # halo slice   (double-buffered)
                + 2 * 8 * C8 * Cout * 2        # resident weight, counted 2x
                + 2 * Cout * 4                 # bias
                + 2 * r * Cout * 4             # f32 output block (double-buffered)
                + (r + S_pad + Wq + 1) * C8 * 2)   # ybuf scratch

    divisors = [d for d in range(Do, 0, -1) if Do % d == 0]
    if N == 1 and Do > 1:
        # Keep >= 2 grid steps so the "parallel" axes shard across both v7x cores.
        divisors = [d for d in divisors if d <= Do // 2] or [1]
    t_od = next((d for d in divisors if _vmem_bytes(d) <= vmem_target_bytes),
                divisors[-1])
    n_dt = Do // t_od
    R = t_od * S_pad

    vmem_est = _vmem_bytes(t_od)
    # Always explicit (v5e default scoped window is only 16 MiB); capped for v7x.
    vmem_limit = int(min(vmem_est + (8 << 20), 48 << 20))

    kernel = functools.partial(_conv_s2d_kernel, t_od=t_od, s_pad=S_pad, wq=Wq)

    out_raw = pl.pallas_call(
        kernel,
        out_shape=jax.ShapeDtypeStruct((N, Do * S_pad, Cout), jnp.float32),
        grid_spec=pltpu.PrefetchScalarGridSpec(
            num_scalar_prefetch=0,
            grid=(N, n_dt),
            in_specs=[
                pl.BlockSpec((None, R, C8), lambda n, i: (n, i, 0)),
                pl.BlockSpec((None, S_pad, C8), lambda n, i: (n, (i + 1) * t_od, 0)),
                pl.BlockSpec((8, C8, Cout), lambda n, i: (0, 0, 0)),
                pl.BlockSpec((1, Cout), lambda n, i: (0, 0)),
            ],
            out_specs=pl.BlockSpec((None, R, Cout), lambda n, i: (n, i, 0)),
            scratch_shapes=[pltpu.VMEM((R + S_pad + Wq + 1, C8), jnp.bfloat16)],
        ),
        compiler_params=pltpu.CompilerParams(
            dimension_semantics=("parallel", "parallel"),
            vmem_limit_bytes=vmem_limit,
        ),
    )(ys, ys, wg, b2)

    # Drop the junk rows/columns and go back to NCDHW.
    out = out_raw.reshape(N, Do, S_pad, Cout)[:, :, :Hq * Wq, :]
    out = out.reshape(N, Do, Hq, Wq, Cout)[:, :, :Ho, :Wo, :]
    return jnp.transpose(out, (0, 4, 1, 2, 3)).astype(x.dtype)


def _reference(x, w, b):
    y = lax.conv_general_dilated(
        x, w,
        window_strides=(STRIDE,) * 3,
        padding=[(PAD, PAD)] * 3,
        dimension_numbers=("NCDHW", "OIDHW", "NCDHW"),
    )
    return y + b.reshape(1, -1, 1, 1, 1)


if __name__ == "__main__":
    key = jax.random.PRNGKey(0)
    kx, kw, kb = jax.random.split(key, 3)

    N, C, D, H, W = 2, 4, 8, 8, 8
    x = jax.random.normal(kx, (N, C, D, H, W), dtype=jnp.float32)

    # Deterministic parameter init (PyTorch-style uniform bound 1/sqrt(fan_in)).
    fan_in = C * KERNEL ** 3
    bound = 1.0 / jnp.sqrt(jnp.float32(fan_in))
    w = jax.random.uniform(kw, (C, C, KERNEL, KERNEL, KERNEL),
                           dtype=jnp.float32, minval=-bound, maxval=bound)
    b = jax.random.uniform(kb, (C,), dtype=jnp.float32, minval=-bound, maxval=bound)

    y = jax.block_until_ready(downsample_block(x, w, b))
    y_ref = jax.block_until_ready(_reference(x, w, b))

    assert y.shape == (N, C, D // 2, H // 2, W // 2), y.shape
    # bf16 inputs with f32 accumulation -> loosened tolerance vs the f32 reference.
    assert jnp.allclose(y, y_ref, atol=2e-2, rtol=2e-2), float(jnp.max(jnp.abs(y - y_ref)))

    print("KERNEL_OK")
</pallas_src>

<mosaic_0001>
module attributes {stable_mosaic.version = 11 : i64} {
  func.func @_conv_s2d_kernel(%arg0: i32, %arg1: i32, %arg2: memref<1x128x32xbf16, #tpu.memory_space<vmem>>, %arg3: memref<1x32x32xbf16, #tpu.memory_space<vmem>>, %arg4: memref<8x32x4xbf16, #tpu.memory_space<vmem>>, %arg5: memref<1x4xf32, #tpu.memory_space<vmem>>, %arg6: memref<1x128x4xf32, #tpu.memory_space<vmem>>, %arg7: memref<166x32xbf16, #tpu.memory_space<vmem>>) attributes {dimension_semantics = [#tpu.dimension_semantics<parallel>, #tpu.dimension_semantics<parallel>], iteration_bounds = array<i64: 2, 1>, scalar_prefetch = 0 : i64, scratch_operands = 1 : i64, tpu.core_type = #tpu.core_type<tc>, window_params = [{transform_indices = @transform_0, window_bounds = array<i64: 1, 128, 32>}, {transform_indices = @transform_1, window_bounds = array<i64: 1, 32, 32>}, {pipeline_mode = #tpu.pipeline_mode<synchronous>, transform_indices = @transform_2, window_bounds = array<i64: 8, 32, 4>}, {pipeline_mode = #tpu.pipeline_mode<synchronous>, transform_indices = @transform_3, window_bounds = array<i64: 1, 4>}, {transform_indices = @transform_4, window_bounds = array<i64: 1, 128, 4>}]} {
    %c0 = arith.constant 0 : index
    %c0_0 = arith.constant 0 : index
    %c0_1 = arith.constant 0 : index
    %0 = vector.load %arg2[%c0, %c0_0, %c0_1] : memref<1x128x32xbf16, #tpu.memory_space<vmem>>, vector<1x128x32xbf16>
    %1 = vector.shape_cast %0 : vector<1x128x32xbf16> to vector<128x32xbf16>
    %c0_2 = arith.constant 0 : index
    %c0_3 = arith.constant 0 : index
    %2 = vector.load %arg7[%c0_2, %c0_3] : memref<166x32xbf16, #tpu.memory_space<vmem>>, vector<128x32xbf16>
    tpu.vector_store %arg7[%c0_2, %c0_3], %1 {strides = array<i32>} : memref<166x32xbf16, #tpu.memory_space<vmem>>, vector<128x32xbf16>,
    %c0_4 = arith.constant 0 : index
    %c0_5 = arith.constant 0 : index
    %c0_6 = arith.constant 0 : index
    %3 = vector.load %arg3[%c0_4, %c0_5, %c0_6] : memref<1x32x32xbf16, #tpu.memory_space<vmem>>, vector<1x32x32xbf16>
    %4 = vector.shape_cast %3 : vector<1x32x32xbf16> to vector<32x32xbf16>
    %c128 = arith.constant 128 : index
    %c0_7 = arith.constant 0 : index
    %5 = vector.load %arg7[%c128, %c0_7] : memref<166x32xbf16, #tpu.memory_space<vmem>>, vector<32x32xbf16>
    tpu.vector_store %arg7[%c128, %c0_7], %4 {strides = array<i32>} : memref<166x32xbf16, #tpu.memory_space<vmem>>, vector<32x32xbf16>,
    %cst = arith.constant 0.000000e+00 : bf16
    %6 = vector.broadcast %cst : bf16 to vector<6x32xbf16>
    %c160 = arith.constant 160 : index
    %c0_8 = arith.constant 0 : index
    %7 = vector.load %arg7[%c160, %c0_8] : memref<166x32xbf16, #tpu.memory_space<vmem>>, vector<6x32xbf16>
    tpu.vector_store %arg7[%c160, %c0_8], %6 {strides = array<i32>} : memref<166x32xbf16, #tpu.memory_space<vmem>>, vector<6x32xbf16>,
    %c0_9 = arith.constant 0 : index
    %c0_10 = arith.constant 0 : index
    %8 = vector.load %arg5[%c0_9, %c0_10] : memref<1x4xf32, #tpu.memory_space<vmem>>, vector<1x4xf32>
    %9 = vector.shape_cast %8 : vector<1x4xf32> to vector<1x4xf32>
    %10 = vector.broadcast %9 : vector<1x4xf32> to vector<128x4xf32>
    %c0_11 = arith.constant 0 : index
    %c0_12 = arith.constant 0 : index
    %c0_13 = arith.constant 0 : index
    %11 = vector.load %arg6[%c0_11, %c0_12, %c0_13] : memref<1x128x4xf32, #tpu.memory_space<vmem>>, vector<1x128x4xf32>
    %12 = vector.shape_cast %11 : vector<1x128x4xf32> to vector<128x4xf32>
    %13 = vector.shape_cast %10 : vector<128x4xf32> to vector<1x128x4xf32>
    tpu.vector_store %arg6[%c0_11, %c0_12, %c0_13], %13 {strides = array<i32>} : memref<1x128x4xf32, #tpu.memory_space<vmem>>, vector<1x128x4xf32>,
    %c0_14 = arith.constant 0 : index
    %c0_15 = arith.constant 0 : index
    %c0_16 = arith.constant 0 : index
    %14 = vector.load %arg6[%c0_14, %c0_15, %c0_16] : memref<1x128x4xf32, #tpu.memory_space<vmem>>, vector<1x128x4xf32>
    %15 = vector.shape_cast %14 : vector<1x128x4xf32> to vector<128x4xf32>
    %c0_17 = arith.constant 0 : index
    %c0_18 = arith.constant 0 : index
    %16 = vector.load %arg7[%c0_17, %c0_18] : memref<166x32xbf16, #tpu.memory_space<vmem>>, vector<128x32xbf16>
    %c0_19 = arith.constant 0 : index
    %c0_20 = arith.constant 0 : index
    %c0_21 = arith.constant 0 : index
    %17 = vector.load %arg4[%c0_19, %c0_20, %c0_21] : memref<8x32x4xbf16, #tpu.memory_space<vmem>>, vector<1x32x4xbf16>
    %18 = vector.shape_cast %17 : vector<1x32x4xbf16> to vector<32x4xbf16>
    %cst_22 = arith.constant dense<0.000000e+00> : vector<128x4xf32>
    %19 = tpu.matmul %16, %18, %cst_22 {dimension_numbers = #tpu.dot_dimension_numbers<[1], [0], [0], [1], [0, 0, 1, 1], [], []>} : vector<128x32xbf16>, vector<32x4xbf16>, vector<128x4xf32> -> vector<128x4xf32>
    %20 = arith.addf %15, %19 : vector<128x4xf32>
    %c0_23 = arith.constant 0 : index
    %c0_24 = arith.constant 0 : index
    %c0_25 = arith.constant 0 : index
    %21 = vector.load %arg6[%c0_23, %c0_24, %c0_25] : memref<1x128x4xf32, #tpu.memory_space<vmem>>, vector<1x128x4xf32>
    %22 = vector.shape_cast %21 : vector<1x128x4xf32> to vector<128x4xf32>
    %23 = vector.shape_cast %20 : vector<128x4xf32> to vector<1x128x4xf32>
    tpu.vector_store %arg6[%c0_23, %c0_24, %c0_25], %23 {strides = array<i32>} : memref<1x128x4xf32, #tpu.memory_space<vmem>>, vector<1x128x4xf32>,
    %c0_26 = arith.constant 0 : index
    %c0_27 = arith.constant 0 : index
    %c0_28 = arith.constant 0 : index
    %24 = vector.load %arg6[%c0_26, %c0_27, %c0_28] : memref<1x128x4xf32, #tpu.memory_space<vmem>>, vector<1x128x4xf32>
    %25 = vector.shape_cast %24 : vector<1x128x4xf32> to vector<128x4xf32>
    %c1 = arith.constant 1 : index
    %c0_29 = arith.constant 0 : index
    %26 = vector.load %arg7[%c1, %c0_29] : memref<166x32xbf16, #tpu.memory_space<vmem>>, vector<128x32xbf16>
    %c1_30 = arith.constant 1 : index
    %c0_31 = arith.constant 0 : index
    %c0_32 = arith.constant 0 : index
    %27 = vector.load %arg4[%c1_30, %c0_31, %c0_32] : memref<8x32x4xbf16, #tpu.memory_space<vmem>>, vector<1x32x4xbf16>
    %28 = vector.shape_cast %27 : vector<1x32x4xbf16> to vector<32x4xbf16>
    %cst_33 = arith.constant dense<0.000000e+00> : vector<128x4xf32>
    %29 = tpu.matmul %26, %28, %cst_33 {dimension_numbers = #tpu.dot_dimension_numbers<[1], [0], [0], [1], [0, 0, 1, 1], [], []>} : vector<128x32xbf16>, vector<32x4xbf16>, vector<128x4xf32> -> vector<128x4xf32>
    %30 = arith.addf %25, %29 : vector<128x4xf32>
    %c0_34 = arith.constant 0 : index
    %c0_35 = arith.constant 0 : index
    %c0_36 = arith.constant 0 : index
    %31 = vector.load %arg6[%c0_34, %c0_35, %c0_36] : memref<1x128x4xf32, #tpu.memory_space<vmem>>, vector<1x128x4xf32>
    %32 = vector.shape_cast %31 : vector<1x128x4xf32> to vector<128x4xf32>
    %33 = vector.shape_cast %30 : vector<128x4xf32> to vector<1x128x4xf32>
    tpu.vector_store %arg6[%c0_34, %c0_35, %c0_36], %33 {strides = array<i32>} : memref<1x128x4xf32, #tpu.memory_space<vmem>>, vector<1x128x4xf32>,
    %c0_37 = arith.constant 0 : index
    %c0_38 = arith.constant 0 : index
    %c0_39 = arith.constant 0 : index
    %34 = vector.load %arg6[%c0_37, %c0_38, %c0_39] : memref<1x128x4xf32, #tpu.memory_space<vmem>>, vector<1x128x4xf32>
    %35 = vector.shape_cast %34 : vector<1x128x4xf32> to vector<128x4xf32>
    %c5 = arith.constant 5 : index
    %c0_40 = arith.constant 0 : index
    %36 = vector.load %arg7[%c5, %c0_40] : memref<166x32xbf16, #tpu.memory_space<vmem>>, vector<128x32xbf16>
    %c2 = arith.constant 2 : index
    %c0_41 = arith.constant 0 : index
    %c0_42 = arith.constant 0 : index
    %37 = vector.load %arg4[%c2, %c0_41, %c0_42] : memref<8x32x4xbf16, #tpu.memory_space<vmem>>, vector<1x32x4xbf16>
    %38 = vector.shape_cast %37 : vector<1x32x4xbf16> to vector<32x4xbf16>
    %cst_43 = arith.constant dense<0.000000e+00> : vector<128x4xf32>
    %39 = tpu.matmul %36, %38, %cst_43 {dimension_numbers = #tpu.dot_dimension_numbers<[1], [0], [0], [1], [0, 0, 1, 1], [], []>} : vector<128x32xbf16>, vector<32x4xbf16>, vector<128x4xf32> -> vector<128x4xf32>
    %40 = arith.addf %35, %39 : vector<128x4xf32>
    %c0_44 = arith.constant 0 : index
    %c0_45 = arith.constant 0 : index
    %c0_46 = arith.constant 0 : index
    %41 = vector.load %arg6[%c0_44, %c0_45, %c0_46] : memref<1x128x4xf32, #tpu.memory_space<vmem>>, vector<1x128x4xf32>
    %42 = vector.shape_cast %41 : vector<1x128x4xf32> to vector<128x4xf32>
    %43 = vector.shape_cast %40 : vector<128x4xf32> to vector<1x128x4xf32>
    tpu.vector_store %arg6[%c0_44, %c0_45, %c0_46], %43 {strides = array<i32>} : memref<1x128x4xf32, #tpu.memory_space<vmem>>, vector<1x128x4xf32>,
    %c0_47 = arith.constant 0 : index
    %c0_48 = arith.constant 0 : index
    %c0_49 = arith.constant 0 : index
    %44 = vector.load %arg6[%c0_47, %c0_48, %c0_49] : memref<1x128x4xf32, #tpu.memory_space<vmem>>, vector<1x128x4xf32>
    %45 = vector.shape_cast %44 : vector<1x128x4xf32> to vector<128x4xf32>
    %c6 = arith.constant 6 : index
    %c0_50 = arith.constant 0 : index
    %46 = vector.load %arg7[%c6, %c0_50] : memref<166x32xbf16, #tpu.memory_space<vmem>>, vector<128x32xbf16>
    %c3 = arith.constant 3 : index
    %c0_51 = arith.constant 0 : index
    %c0_52 = arith.constant 0 : index
    %47 = vector.load %arg4[%c3, %c0_51, %c0_52] : memref<8x32x4xbf16, #tpu.memory_space<vmem>>, vector<1x32x4xbf16>
    %48 = vector.shape_cast %47 : vector<1x32x4xbf16> to vector<32x4xbf16>
    %cst_53 = arith.constant dense<0.000000e+00> : vector<128x4xf32>
    %49 = tpu.matmul %46, %48, %cst_53 {dimension_numbers = #tpu.dot_dimension_numbers<[1], [0], [0], [1], [0, 0, 1, 1], [], []>} : vector<128x32xbf16>, vector<32x4xbf16>, vector<128x4xf32> -> vector<128x4xf32>
    %50 = arith.addf %45, %49 : vector<128x4xf32>
    %c0_54 = arith.constant 0 : index
    %c0_55 = arith.constant 0 : index
    %c0_56 = arith.constant 0 : index
    %51 = vector.load %arg6[%c0_54, %c0_55, %c0_56] : memref<1x128x4xf32, #tpu.memory_space<vmem>>, vector<1x128x4xf32>
    %52 = vector.shape_cast %51 : vector<1x128x4xf32> to vector<128x4xf32>
    %53 = vector.shape_cast %50 : vector<128x4xf32> to vector<1x128x4xf32>
    tpu.vector_store %arg6[%c0_54, %c0_55, %c0_56], %53 {strides = array<i32>} : memref<1x128x4xf32, #tpu.memory_space<vmem>>, vector<1x128x4xf32>,
    %c0_57 = arith.constant 0 : index
    %c0_58 = arith.constant 0 : index
    %c0_59 = arith.constant 0 : index
    %54 = vector.load %arg6[%c0_57, %c0_58, %c0_59] : memref<1x128x4xf32, #tpu.memory_space<vmem>>, vector<1x128x4xf32>
    %55 = vector.shape_cast %54 : vector<1x128x4xf32> to vector<128x4xf32>
    %c32 = arith.constant 32 : index
    %c0_60 = arith.constant 0 : index
    %56 = vector.load %arg7[%c32, %c0_60] : memref<166x32xbf16, #tpu.memory_space<vmem>>, vector<128x32xbf16>
    %c4 = arith.constant 4 : index
    %c0_61 = arith.constant 0 : index
    %c0_62 = arith.constant 0 : index
    %57 = vector.load %arg4[%c4, %c0_61, %c0_62] : memref<8x32x4xbf16, #tpu.memory_space<vmem>>, vector<1x32x4xbf16>
    %58 = vector.shape_cast %57 : vector<1x32x4xbf16> to vector<32x4xbf16>
    %cst_63 = arith.constant dense<0.000000e+00> : vector<128x4xf32>
    %59 = tpu.matmul %56, %58, %cst_63 {dimension_numbers = #tpu.dot_dimension_numbers<[1], [0], [0], [1], [0, 0, 1, 1], [], []>} : vector<128x32xbf16>, vector<32x4xbf16>, vector<128x4xf32> -> vector<128x4xf32>
    %60 = arith.addf %55, %59 : vector<128x4xf32>
    %c0_64 = arith.constant 0 : index
    %c0_65 = arith.constant 0 : index
    %c0_66 = arith.constant 0 : index
    %61 = vector.load %arg6[%c0_64, %c0_65, %c0_66] : memref<1x128x4xf32, #tpu.memory_space<vmem>>, vector<1x128x4xf32>
    %62 = vector.shape_cast %61 : vector<1x128x4xf32> to vector<128x4xf32>
    %63 = vector.shape_cast %60 : vector<128x4xf32> to vector<1x128x4xf32>
    tpu.vector_store %arg6[%c0_64, %c0_65, %c0_66], %63 {strides = array<i32>} : memref<1x128x4xf32, #tpu.memory_space<vmem>>, vector<1x128x4xf32>,
    %c0_67 = arith.constant 0 : index
    %c0_68 = arith.constant 0 : index
    %c0_69 = arith.constant 0 : index
    %64 = vector.load %arg6[%c0_67, %c0_68, %c0_69] : memref<1x128x4xf32, #tpu.memory_space<vmem>>, vector<1x128x4xf32>
    %65 = vector.shape_cast %64 : vector<1x128x4xf32> to vector<128x4xf32>
    %c33 = arith.constant 33 : index
    %c0_70 = arith.constant 0 : index
    %66 = vector.load %arg7[%c33, %c0_70] : memref<166x32xbf16, #tpu.memory_space<vmem>>, vector<128x32xbf16>
    %c5_71 = arith.constant 5 : index
    %c0_72 = arith.constant 0 : index
    %c0_73 = arith.constant 0 : index
    %67 = vector.load %arg4[%c5_71, %c0_72, %c0_73] : memref<8x32x4xbf16, #tpu.memory_space<vmem>>, vector<1x32x4xbf16>
    %68 = vector.shape_cast %67 : vector<1x32x4xbf16> to vector<32x4xbf16>
    %cst_74 = arith.constant dense<0.000000e+00> : vector<128x4xf32>
    %69 = tpu.matmul %66, %68, %cst_74 {dimension_numbers = #tpu.dot_dimension_numbers<[1], [0], [0], [1], [0, 0, 1, 1], [], []>} : vector<128x32xbf16>, vector<32x4xbf16>, vector<128x4xf32> -> vector<128x4xf32>
    %70 = arith.addf %65, %69 : vector<128x4xf32>
    %c0_75 = arith.constant 0 : index
    %c0_76 = arith.constant 0 : index
    %c0_77 = arith.constant 0 : index
    %71 = vector.load %arg6[%c0_75, %c0_76, %c0_77] : memref<1x128x4xf32, #tpu.memory_space<vmem>>, vector<1x128x4xf32>
    %72 = vector.shape_cast %71 : vector<1x128x4xf32> to vector<128x4xf32>
    %73 = vector.shape_cast %70 : vector<128x4xf32> to vector<1x128x4xf32>
    tpu.vector_store %arg6[%c0_75, %c0_76, %c0_77], %73 {strides = array<i32>} : memref<1x128x4xf32, #tpu.memory_space<vmem>>, vector<1x128x4xf32>,
    %c0_78 = arith.constant 0 : index
    %c0_79 = arith.constant 0 : index
    %c0_80 = arith.constant 0 : index
    %74 = vector.load %arg6[%c0_78, %c0_79, %c0_80] : memref<1x128x4xf32, #tpu.memory_space<vmem>>, vector<1x128x4xf32>
    %75 = vector.shape_cast %74 : vector<1x128x4xf32> to vector<128x4xf32>
    %c37 = arith.constant 37 : index
    %c0_81 = arith.constant 0 : index
    %76 = vector.load %arg7[%c37, %c0_81] : memref<166x32xbf16, #tpu.memory_space<vmem>>, vector<128x32xbf16>
    %c6_82 = arith.constant 6 : index
    %c0_83 = arith.constant 0 : index
    %c0_84 = arith.constant 0 : index
    %77 = vector.load %arg4[%c6_82, %c0_83, %c0_84] : memref<8x32x4xbf16, #tpu.memory_space<vmem>>, vector<1x32x4xbf16>
    %78 = vector.shape_cast %77 : vector<1x32x4xbf16> to vector<32x4xbf16>
    %cst_85 = arith.constant dense<0.000000e+00> : vector<128x4xf32>
    %79 = tpu.matmul %76, %78, %cst_85 {dimension_numbers = #tpu.dot_dimension_numbers<[1], [0], [0], [1], [0, 0, 1, 1], [], []>} : vector<128x32xbf16>, vector<32x4xbf16>, vector<128x4xf32> -> vector<128x4xf32>
    %80 = arith.addf %75, %79 : vector<128x4xf32>
    %c0_86 = arith.constant 0 : index
    %c0_87 = arith.constant 0 : index
    %c0_88 = arith.constant 0 : index
    %81 = vector.load %arg6[%c0_86, %c0_87, %c0_88] : memref<1x128x4xf32, #tpu.memory_space<vmem>>, vector<1x128x4xf32>
    %82 = vector.shape_cast %81 : vector<1x128x4xf32> to vector<128x4xf32>
    %83 = vector.shape_cast %80 : vector<128x4xf32> to vector<1x128x4xf32>
    tpu.vector_store %arg6[%c0_86, %c0_87, %c0_88], %83 {strides = array<i32>} : memref<1x128x4xf32, #tpu.memory_space<vmem>>, vector<1x128x4xf32>,
    %c0_89 = arith.constant 0 : index
    %c0_90 = arith.constant 0 : index
    %c0_91 = arith.constant 0 : index
    %84 = vector.load %arg6[%c0_89, %c0_90, %c0_91] : memref<1x128x4xf32, #tpu.memory_space<vmem>>, vector<1x128x4xf32>
    %85 = vector.shape_cast %84 : vector<1x128x4xf32> to vector<128x4xf32>
    %c38 = arith.constant 38 : index
    %c0_92 = arith.constant 0 : index
    %86 = vector.load %arg7[%c38, %c0_92] : memref<166x32xbf16, #tpu.memory_space<vmem>>, vector<128x32xbf16>
    %c7 = arith.constant 7 : index
    %c0_93 = arith.constant 0 : index
    %c0_94 = arith.constant 0 : index
    %87 = vector.load %arg4[%c7, %c0_93, %c0_94] : memref<8x32x4xbf16, #tpu.memory_space<vmem>>, vector<1x32x4xbf16>
    %88 = vector.shape_cast %87 : vector<1x32x4xbf16> to vector<32x4xbf16>
    %cst_95 = arith.constant dense<0.000000e+00> : vector<128x4xf32>
    %89 = tpu.matmul %86, %88, %cst_95 {dimension_numbers = #tpu.dot_dimension_numbers<[1], [0], [0], [1], [0, 0, 1, 1], [], []>} : vector<128x32xbf16>, vector<32x4xbf16>, vector<128x4xf32> -> vector<128x4xf32>
    %90 = arith.addf %85, %89 : vector<128x4xf32>
    %c0_96 = arith.constant 0 : index
    %c0_97 = arith.constant 0 : index
    %c0_98 = arith.constant 0 : index
    %91 = vector.load %arg6[%c0_96, %c0_97, %c0_98] : memref<1x128x4xf32, #tpu.memory_space<vmem>>, vector<1x128x4xf32>
    %92 = vector.shape_cast %91 : vector<1x128x4xf32> to vector<128x4xf32>
    %93 = vector.shape_cast %90 : vector<128x4xf32> to vector<1x128x4xf32>
    tpu.vector_store %arg6[%c0_96, %c0_97, %c0_98], %93 {strides = array<i32>} : memref<1x128x4xf32, #tpu.memory_space<vmem>>, vector<1x128x4xf32>,
    return
  }
  func.func @transform_0(%arg0: i32, %arg1: i32) -> (i32, i32, i32) {
    %c0_i32 = arith.constant 0 : i32
    %c0_i32_0 = arith.constant 0 : i32
    return %arg0, %arg1, %c0_i32 : i32, i32, i32
  }
  func.func @transform_1(%arg0: i32, %arg1: i32) -> (i32, i32, i32) {
    %c1_i32 = arith.constant 1 : i32
    %0 = arith.addi %arg1, %c1_i32 : i32
    %c4_i32 = arith.constant 4 : i32
    %1 = arith.muli %0, %c4_i32 : i32
    %c0_i32 = arith.constant 0 : i32
    %c0_i32_0 = arith.constant 0 : i32
    return %arg0, %1, %c0_i32 : i32, i32, i32
  }
  func.func @transform_2(%arg0: i32, %arg1: i32) -> (i32, i32, i32) {
    %c0_i32 = arith.constant 0 : i32
    %c0_i32_0 = arith.constant 0 : i32
    %c0_i32_1 = arith.constant 0 : i32
    %c0_i32_2 = arith.constant 0 : i32
    return %c0_i32, %c0_i32_0, %c0_i32_1 : i32, i32, i32
  }
  func.func @transform_3(%arg0: i32, %arg1: i32) -> (i32, i32) {
    %c0_i32 = arith.constant 0 : i32
    %c0_i32_0 = arith.constant 0 : i32
    %c0_i32_1 = arith.constant 0 : i32
    return %c0_i32, %c0_i32_0 : i32, i32
  }
  func.func @transform_4(%arg0: i32, %arg1: i32) -> (i32, i32, i32) {
    %c0_i32 = arith.constant 0 : i32
    %c0_i32_0 = arith.constant 0 : i32
    return %arg0, %arg1, %c0_i32 : i32, i32, i32
  }
}

</mosaic_0001>

<bundles_post_ra>
// kernel: tpu_custom_call.1
= control target key start
LH: loop header
LB: loop body
LE: loop exit
PB: predicated region body
PF: predicated region fallthrough
CT: control target
= control target key end

     0   :  { %s3370_s15 = smov 0   ;;  %s3372_s16 = smov 0   ;;  %s4057_s0 = inlined_call_operand.vmem [shape: bf16[2,160,32], index: 0, kind: input, shape index: {}]   ;;  %s4058_s1 = inlined_call_operand.vmem [shape: bf16[2,160,32], index: 1, kind: input, shape index: {}]   ;;  %s4059_s2 = inlined_call_operand.vmem [shape: bf16[8,32,4], index: 2, kind: input, shape index: {}]   ;;  %s4060_s3 = inlined_call_operand.vmem [shape: f32[1,4], index: 3, kind: input, shape index: {}]   ;;  %s4061_s4 = inlined_call_operand.vmem [shape: f32[2,128,4], index: 4, kind: output, shape index: {}]  }
   0x1   :  { %s3374_s17 = smov 0  }
   0x2 LB: > { %s26_s18 = sadd.s32 1, %s3338_s16  ;;  %p2777_p0 = scmp.ge.s32.totalorder %s3342_s17, 1  ;;  %s3342_s17 = sphi %s3374_s17, %s14_s17   ;;  %s3338_s16 = sphi %s3372_s16, %s4063_s16   ;;  %s3334_s15 = sphi %s3370_s15, %s4062_s15  }
   0x3   : > { %p28_p1 = scmp.ge.s32.totalorder %s26_s18, 2  ;;  %p216_p2 = scmp.lt.s32.totalorder %s3342_s17, 3 }
   0x5   : > { %s4065_s18 = smov (%p28_p1, %s26_s18), 0  ;;  %p217_p3 = pnand %p2777_p0, %p216_p2 }
   0x6   : > { %p270_p4 = scmp.lt.s32.totalorder (!%p217_p3), %s3334_s15, 1 }
   0x7   : > { %220 = sbr.rel (%p217_p3) target bundleno = 361 (0x169), region = 36 }
   0xc   : > { %v3234_v0 = vld [vmem:[%s4059_s2 + $0x8] sm:$0xff]   ;;  %v3235_v1 = vld [vmem:[%s4059_s2] sm:$0xff]   ;;  %s4067_s15 = smov (!%p270_p4, %s3334_s15), 1  ;;  %v3237_v2 = vld [vmem:[%s4059_s2 + $0x18] sm:$0xff]   ;;  %vm324_vm0 = vcmask 257024   ;;  %vm349_vm1 = vcmask 256000  }
   0xd   : > { %3046 = vmatprep.subr.bf16.mxu0 %v3234_v0  ;;  %s3206_s25 = smul.u32 80, %s4067_s15  ;;  %v3238_v3 = vld [vmem:[%s4059_s2 + $0x28] sm:$0xff]   ;;  %v3240_v4 = vld [vmem:[%s4059_s2 + $0x10] sm:$0xff]   ;;  %3066 = vmatprep.subr.bf16.mxu1 %v3237_v2  ;;  %v3409_v5 = vld [vmem:[%s4059_s2 + $0x38] sm:$0xff]   ;;  %vm463_vm2 = vcmask 261120   ;;  %v3344_v26 = vmov 0  }
   0xe   : > { %3047 = vmatpush3.bf16.msra.mxu0 %v3234_v0  ;;  %3067 = vmatpush3.bf16.msra.mxu1 %v3237_v2  ;;  %v3250_v22 = vld [vmem:[%s4059_s2 + $0x20] sm:$0xff]   ;;  %350 = vst.msk [vmem:[#allocation2 + $0x50] sm:$0x7] %vm349_vm1, %v3344_v26  ;;  %vm698_vm3 = vsmask.f32 7424  ;;  %v3256_v45 = vld [vmem:[%s4059_s2 + $0x30] sm:$0xff]  }
   0xf   : > { %3048 = vmatprep.subr.bf16.mxu0 %v3235_v1  ;;  %s3416_s8 = scalar_lea.vmem %s4057_s0, %s3206_s25  ;;  %3068 = vmatprep.subr.bf16.mxu1 %v3240_v4  ;;  %s2964_s9 = sadd.s32 64, %s3206_s25  ;;  %vm1013_vm4 = vsmask.f32 5376  ;;  %vm1340_vm5 = vcmask 1044480   ;;  %vm358_vm6 = vcmask 31744  }
  0x10   : > { %v308_v6 = vld [vmem:[%s3416_s8] sm:$0xf]  ;;  %v309_v7 = vld [vmem:[%s3416_s8 + $0x4] sm:$0xf]  ;;  %v310_v8 = vld [vmem:[%s3416_s8 + $0x8] sm:$0xf]  ;;  %s3447_s12 = scalar_lea.vmem %s4058_s1, %s2964_s9 }
  0x11   : > { %325 = vst.msk [vmem:[#allocation2] sm:$0xf] %vm324_vm0, %v308_v6  ;;  %326 = vst.msk [vmem:[#allocation2 + $0x4] sm:$0xf] %vm324_vm0, %v309_v7  ;;  %v311_v9 = vld [vmem:[%s3416_s8 + $0xc] sm:$0xf] }
  0x12   : > { %3049 = vmatpush3.bf16.msra.mxu0 %v3235_v1  ;;  %327 = vst.msk [vmem:[#allocation2 + $0x8] sm:$0xf] %vm324_vm0, %v310_v8  ;;  %v312_v10 = vld [vmem:[%s3416_s8 + $0x10] sm:$0xf]  ;;  %v313_v11 = vld [vmem:[%s3416_s8 + $0x14] sm:$0xf]  ;;  %3069 = vmatpush3.bf16.msra.mxu1 %v3240_v4 }
  0x13   : > { %3086 = vmatprep.subr.bf16.mxu0 %v3238_v3  ;;  %328 = vst.msk [vmem:[#allocation2 + $0xc] sm:$0xf] %vm324_vm0, %v311_v9  ;;  %329 = vst.msk [vmem:[#allocation2 + $0x10] sm:$0xf] %vm324_vm0, %v312_v10  ;;  %v314_v12 = vld [vmem:[%s3416_s8 + $0x18] sm:$0xf]  ;;  %3106 = vmatprep.subr.bf16.mxu1 %v3409_v5 }
  0x14   : > { %330 = vst.msk [vmem:[#allocation2 + $0x14] sm:$0xf] %vm324_vm0, %v313_v11  ;;  %v315_v13 = vld [vmem:[%s3416_s8 + $0x1c] sm:$0xf]  ;;  %v316_v14 = vld [vmem:[%s3416_s8 + $0x20] sm:$0xf] }
  0x15   : > { %331 = vst.msk [vmem:[#allocation2 + $0x18] sm:$0xf] %vm324_vm0, %v314_v12  ;;  %332 = vst.msk [vmem:[#allocation2 + $0x1c] sm:$0xf] %vm324_vm0, %v315_v13  ;;  %v317_v15 = vld [vmem:[%s3416_s8 + $0x24] sm:$0xf] }
  0x16   : > { %333 = vst.msk [vmem:[#allocation2 + $0x20] sm:$0xf] %vm324_vm0, %v316_v14  ;;  %334 = vst.msk [vmem:[#allocation2 + $0x24] sm:$0xf] %vm324_vm0, %v317_v15  ;;  %v318_v16 = vld [vmem:[%s3416_s8 + $0x28] sm:$0xf] }
  0x17   : > { %v319_v17 = vld [vmem:[%s3416_s8 + $0x2c] sm:$0xf]  ;;  %v320_v18 = vld [vmem:[%s3416_s8 + $0x30] sm:$0xf]  ;;  %335 = vst.msk [vmem:[#allocation2 + $0x28] sm:$0xf] %vm324_vm0, %v318_v16 }
  0x18   : > { %336 = vst.msk [vmem:[#allocation2 + $0x2c] sm:$0xf] %vm324_vm0, %v319_v17  ;;  %v321_v19 = vld [vmem:[%s3416_s8 + $0x34] sm:$0xf]  ;;  %337 = vst.msk [vmem:[#allocation2 + $0x30] sm:$0xf] %vm324_vm0, %v320_v18 }
  0x19   : > { %v322_v20 = vld [vmem:[%s3416_s8 + $0x38] sm:$0xf]  ;;  %v323_v21 = vld [vmem:[%s3416_s8 + $0x3c] sm:$0xf]  ;;  %338 = vst.msk [vmem:[#allocation2 + $0x34] sm:$0xf] %vm324_vm0, %v321_v19 }
  0x1a   : > { %339 = vst.msk [vmem:[#allocation2 + $0x38] sm:$0xf] %vm324_vm0, %v322_v20  ;;  %340 = vst.msk [vmem:[#allocation2 + $0x3c] sm:$0xf] %vm324_vm0, %v323_v21  ;;  %v341_v23 = vld [vmem:[%s3447_s12] sm:$0xf] }
  0x1b   : > { %v3236_v24 = vld [vmem:[#allocation2] sm:$0xff]   ;;  %345 = vst.msk [vmem:[#allocation2 + $0x40] sm:$0xf] %vm324_vm0, %v341_v23  ;;  %v3239_v25 = vld [vmem:[#allocation2 + $0x8] sm:$0xff]   ;;  %v3243_v29 = vld [vmem:[#allocation2 + $0x10] sm:$0xff]   ;;  %s2965_s11 = sshll.u32 %s4067_s15, 7 }
  0x1c   : > { %3050 = vmatprep.mubr.msk.bf16.mxu0 %vm463_vm2, %v3236_v24  ;;  %v3241_v27 = vld [vmem:[#allocation2] sm:$0xff]   ;;  %v3242_v28 = vld [vmem:[#allocation2 + $0x8] sm:$0xff]   ;;  %v3244_v34 = vld [vmem:[#allocation2 + $0x10] sm:$0xff]   ;;  %s3584_s14 = scalar_lea.vmem %s4061_s4, %s2965_s11 }
  0x1d   : > { %3051 = vmatmul.mubr.msk.bf16.vlgmr.msra.gmra.mxu0 %vm463_vm2, %v3239_v25  ;;  %v700_v30 = vshrl.u32 %v3241_v27, 16  ;;  %v702_v31 = vshll.u32 %v3241_v27, 16  ;;  %v707_v32 = vshll.u32 %v3242_v28, 16  ;;  %v711_v33 = vshrl.u32 %v3242_v28, 16  ;;  %v3245_v37 = vld [vmem:[#allocation2 + $0x18] sm:$0xff]   ;;  %v3248_v44 = vld [vmem:[#allocation2 + $0x20] sm:$0xff]  }
  0x1e   : > { %3087 = vmatpush3.bf16.msra.mxu0 %v3238_v3  ;;  %3054 = vmatprep.mubr.msk.bf16.mxu0 %vm463_vm2, %v3243_v29  ;;  %v3247_v38 = vld [vmem:[#allocation2 + $0x18] sm:$0xff]   ;;  %v715_v39 = vshll.u32 %v3244_v34, 16  ;;  %v719_v40 = vshrl.u32 %v3244_v34, 16  ;;  %v3249_v47 = vld [vmem:[#allocation2 + $0x20] sm:$0xff]   ;;  %v3260_v6 = vld [vmem:[#allocation2 + $0x8] sm:$0xff]  }
  0x1f   : > { %3088 = vmatprep.subr.bf16.mxu0 %v3250_v22  ;;  %v704_v35 = vrot.slane %v702_v31, 1  ;;  %v709_v36 = vrot.slane %v707_v32, 1  ;;  %v723_v43 = vshll.u32 %v3247_v38, 16  ;;  %v727_v50 = vshrl.u32 %v3247_v38, 16  ;;  %v3252_v54 = vld [vmem:[#allocation2 + $0x28] sm:$0xff]   ;;  %v3262_v18 = vld [vmem:[#allocation2 + $0x10] sm:$0xff]  }
  0x20   : > { %v717_v46 = vrot.slane %v715_v39, 1  ;;  %v731_v53 = vshll.u32 %v3249_v47, 16  ;;  %v735_v55 = vshrl.u32 %v3249_v47, 16  ;;  %v3251_v59 = vld [vmem:[#allocation2 + $0x28] sm:$0xff]   ;;  %v739_v60 = vshll.u32 %v3252_v54, 16  ;;  %v3253_v61 = vld [vmem:[#allocation2 + $0x30] sm:$0xff]  }
  0x21   : > { %v705_v41 = vor.u32 %v704_v35, %v700_v30  ;;  %v713_v42 = vor.u32 %v711_v33, %v709_v36  ;;  %v725_v49 = vrot.slane %v723_v43, 1  ;;  %v3254_v62 = vld [vmem:[#allocation2 + $0x30] sm:$0xff]   ;;  %v743_v1 = vshrl.u32 %v3252_v54, 16  ;;  %v3257_v3 = vld [vmem:[#allocation2 + $0x38] sm:$0xff]   ;;  %v3259_v12 = vld [vmem:[#allocation2] sm:$0xfc]  }
  0x22   : > { %3089 = vmatpush3.bf16.msra.mxu0 %v3250_v22  ;;  %v721_v52 = vor.u32 %v719_v40, %v717_v46  ;;  %v733_v58 = vrot.slane %v731_v53, 1  ;;  %v741_v0 = vrot.slane %v739_v60, 1  ;;  %v747_v2 = vshll.u32 %v3254_v62, 16  ;;  %v3255_v14 = vld [vmem:[#allocation2 + $0x38] sm:$0xff]   ;;  %v3261_v17 = vld [vmem:[%s4059_s2 + $0x48] sm:$0xff]   ;;  %v3272_v60 = vld [vmem:[%s4059_s2 + $0x40] sm:$0xff]  }
  0x23   : > { %v710_v48 = vsel %vm698_vm3, %v705_v41, %v709_v36  ;;  %v718_v51 = vsel %vm698_vm3, %v713_v42, %v717_v46  ;;  %v729_v57 = vor.u32 %v727_v50, %v725_v49  ;;  %v751_v8 = vshrl.u32 %v3254_v62, 16  ;;  %3126 = vmatprep.subr.bf16.mxu0 %v3261_v17  ;;  %v3487_v31 = vld [vmem:[#allocation2 + $0x8] sm:$0xff]   ;;  %v3263_v36 = vld [vmem:[#allocation2] sm:$0xf8]   ;;  %v3268_v46 = vld [vmem:[%s4059_s2 + $0x58] sm:$0xff]  }
  0x24   : > { %3070 = vmatprep.mubr.msk.bf16.mxu1 %vm463_vm2, %v710_v48  ;;  %v726_v56 = vsel %vm698_vm3, %v721_v52, %v725_v49  ;;  %v737_v63 = vor.u32 %v735_v55, %v733_v58  ;;  %v755_v9 = vshll.u32 %v3257_v3, 16  ;;  %v749_v10 = vrot.slane %v747_v2, 1  ;;  %v3270_v53 = vld [vmem:[#allocation2 + $0x28] sm:$0xff]   ;;  %v3266_v55 = vld [vmem:[#allocation2 + $0x10] sm:$0xff]   ;;  %v3269_v62 = vld [vmem:[#allocation2 + $0x18] sm:$0xff]  }
  0x25   : > { %3055 = vmatmul.mubr.msk.bf16.gmra.mxu0 %vm463_vm2, %v3245_v37  ;;  %3071 = vmatmul.mubr.msk.bf16.vlgmr.msra.gmra.mxu1 %vm463_vm2, %v718_v51  ;;  %v734_v4 = vsel %vm698_vm3, %v729_v57, %v733_v58  ;;  %v759_v11 = vshrl.u32 %v3257_v3, 16  ;;  %v745_v13 = vor.u32 %v743_v1, %v741_v0  ;;  %v1023_v16 = vshrl.u32 %v3260_v6, 16  ;;  %v3265_v37 = vld [vmem:[#allocation2 + $0x18] sm:$0xff]  }
  0x26   : > { %3058 = vmatprep.mubr.msk.bf16.mxu0 %vm463_vm2, %v3248_v44  ;;  %3107 = vmatpush3.bf16.msra.mxu1 %v3409_v5  ;;  %v3258_v5 = vld [vmem:[#allocation2 + $0x40] ss:$0 sps:$4 sm:$0x11]   ;;  %v742_v7 = vsel %vm698_vm3, %v737_v63, %v741_v0  ;;  %v757_v19 = vrot.slane %v755_v9, 1  ;;  %v1015_v20 = vshrl.u32 %v3259_v12, 16  ;;  %v1018_v21 = vshll.u32 %v3259_v12, 16 }
  0x27   : > { %3074 = vmatprep.mubr.msk.bf16.mxu1 %vm463_vm2, %v726_v56  ;;  %3108 = vmatprep.subr.bf16.mxu1 %v3256_v45  ;;  %v763_v15 = vshll.u32 %v3258_v5, 16  ;;  %v1026_v22 = vshll.u32 %v3260_v6, 16  ;;  %v753_v23 = vor.u32 %v751_v8, %v749_v10  ;;  %v1025_v24 = vrot.slane %v1023_v16, 2 }
  0x28   : > { %v1032_v25 = vshrl.u32 %v3262_v18, 16  ;;  %v1017_v26 = vrot.slane %v1015_v20, 2  ;;  %v1020_v27 = vrot.slane %v1018_v21, 3  ;;  %v1035_v29 = vshll.u32 %v3262_v18, 16  ;;  %v3271_v18 = vld [vmem:[#allocation2 + $0x20] sm:$0xff]   ;;  %v3274_v21 = vld [vmem:[#allocation2 + $0x28] sm:$0xff]  }
  0x29   : > { %v1028_v28 = vrot.slane %v1026_v22, 3  ;;  %v750_v32 = vsel %vm698_vm3, %v745_v13, %v749_v10  ;;  %v758_v38 = vsel %vm698_vm3, %v753_v23, %v757_v19  ;;  %v765_v39 = vrot.slane %v763_v15, 1  ;;  %v3275_v10 = vld [vmem:[#allocation2 + $0x38] sm:$0xff]  }
  0x2a   : > { %3109 = vmatpush3.bf16.msra.mxu1 %v3256_v45  ;;  %v1034_v30 = vrot.slane %v1032_v25, 2  ;;  %v1021_v33 = vor.u32 %v1020_v27, %v1017_v26  ;;  %v1037_v35 = vrot.slane %v1035_v29, 3  ;;  %v1041_v42 = vshrl.u32 %v3265_v37, 16  ;;  %v3267_v45 = vld [vmem:[#allocation2 + $0x20] sm:$0xff]  }
  0x2b   : > { %v1029_v34 = vor.u32 %v1028_v28, %v1025_v24  ;;  %v1342_v43 = vrot.slane %v3487_v31, 3  ;;  %v1044_v44 = vshll.u32 %v3265_v37, 16  ;;  %v761_v47 = vor.u32 %v759_v11, %v757_v19  ;;  %3146 = vmatprep.subr.bf16.mxu1 %v3268_v46  ;;  %v3277_v19 = vld [vmem:[#allocation2 + $0x40] ss:$0 sps:$4 sm:$0x77]   ;;  %v3278_v24 = vld [vmem:[%s4059_s2 + $0x50] sm:$0xff]  }
  0x2c   : > { %v1038_v41 = vor.u32 %v1037_v35, %v1034_v30  ;;  %v1341_v48 = vrot.slane %v3263_v36, 3  ;;  %v1043_v49 = vrot.slane %v1041_v42, 2  ;;  %v1050_v51 = vshrl.u32 %v3267_v45, 16 }
  0x2d   : > { %3059 = vmatmul.mubr.msk.bf16.gmra.mxu0 %vm463_vm2, %v3251_v59  ;;  %3075 = vmatmul.mubr.msk.bf16.gmra.mxu1 %vm463_vm2, %v734_v4  ;;  %v1030_v40 = vsel %vm1013_vm4, %v1021_v33, %v1029_v34  ;;  %v1046_v50 = vrot.slane %v1044_v44, 3  ;;  %v1053_v52 = vshll.u32 %v3267_v45, 16  ;;  %v1059_v59 = vshrl.u32 %v3270_v53, 16  ;;  %v3273_v4 = vld [vmem:[#allocation2 + $0x30] sm:$0xff]   ;;  %v3285_v45 = vld [vmem:[#allocation2 + $0x18] sm:$0xff]  }
  0x2e   : > { %3062 = vmatprep.mubr.msk.bf16.mxu0 %vm463_vm2, %v3253_v61  ;;  %3078 = vmatprep.mubr.msk.bf16.mxu1 %vm463_vm2, %v742_v7  ;;  %v1039_v54 = vsel %vm1013_vm4, %v1029_v34, %v1038_v41  ;;  %v1052_v57 = vrot.slane %v1050_v51, 2  ;;  %v766_v61 = vsel %vm698_vm3, %v761_v47, %v765_v39  ;;  %v1062_v63 = vshll.u32 %v3270_v53, 16  ;;  %v3280_v47 = vld [vmem:[#allocation2 + $0x40] ss:$0 sps:$4 sm:$0x77]  }
  0x2f   : > { %v1047_v56 = vor.u32 %v1046_v50, %v1043_v49  ;;  %v1055_v58 = vrot.slane %v1053_v52, 3  ;;  %v1343_v0 = vsel %vm1340_vm5, %v1341_v48, %v1342_v43  ;;  %v1061_v3 = vrot.slane %v1059_v59, 2  ;;  %v3281_v50 = vld [vmem:[#allocation2 + $0x10] sm:$0xff]   ;;  %v342_v59 = vld [vmem:[%s3447_s12 + $0x4] sm:$0xf] }
  0x30   : > { %v1064_v5 = vrot.slane %v1062_v63, 3  ;;  %v1068_v6 = vshrl.u32 %v3273_v4, 16  ;;  %v1071_v7 = vshll.u32 %v3273_v4, 16  ;;  %v1344_v8 = vrot.slane %v3266_v55, 3  ;;  %346 = vst.msk [vmem:[#allocation2 + $0x44] sm:$0xf] %vm324_vm0, %v342_v59 }
  0x31   : > { %v1048_v1 = vsel %vm1013_vm4, %v1038_v41, %v1047_v56  ;;  %v1056_v2 = vor.u32 %v1055_v58, %v1052_v57  ;;  %v1346_v12 = vrot.slane %v3269_v62, 3  ;;  %v1077_v15 = vshrl.u32 %v3275_v10, 16  ;;  %v3284_v41 = vld [vmem:[#allocation2 + $0x10] sm:$0xff]   ;;  %v3283_v58 = vld [vmem:[#allocation2 + $0x18] sm:$0xff]   ;;  %v343_v62 = vld [vmem:[%s3447_s12 + $0x8] sm:$0xf] }
  0x32   : > { %v1065_v9 = vor.u32 %v1064_v5, %v1061_v3  ;;  %v1070_v13 = vrot.slane %v1068_v6, 2  ;;  %v1080_v16 = vshll.u32 %v3275_v10, 16  ;;  %v1345_v20 = vsel %vm1340_vm5, %v1342_v43, %v1344_v8  ;;  %v3535_v43 = vld [vmem:[%s4059_s2 + $0x78] sm:$0xff]   ;;  %347 = vst.msk [vmem:[#allocation2 + $0x48] sm:$0xf] %vm324_vm0, %v343_v62  ;;  %v3293_v3 = vld [vmem:[%s4059_s2 + $0x60] sm:$0xff]  }
  0x33   : > { %v1057_v11 = vsel %vm1013_vm4, %v1047_v56, %v1056_v2  ;;  %v1079_v22 = vrot.slane %v1077_v15, 2  ;;  %v1347_v25 = vsel %vm1340_vm5, %v1344_v8, %v1346_v12  ;;  %v1086_v26 = vshrl.u32 %v3277_v19, 16  ;;  %v3287_v56 = vld [vmem:[#allocation2 + $0x20] sm:$0xff]  }
  0x34   : > { %v1082_v23 = vrot.slane %v1080_v16, 3  ;;  %v1089_v27 = vshll.u32 %v3277_v19, 16  ;;  %v1348_v29 = vrot.slane %v3271_v18, 3  ;;  %v1350_v31 = vrot.slane %v3274_v21, 3 }
  0x35   : > { %3063 = vmatmul.mubr.msk.bf16.gmra.mxu0 %vm463_vm2, %v3255_v14  ;;  %3079 = vmatmul.mubr.msk.bf16.gmra.mxu1 %vm463_vm2, %v750_v32  ;;  %v1073_v14 = vrot.slane %v1071_v7, 3  ;;  %v3282_v32 = vld [vmem:[%s4059_s2 + $0x68] sm:$0xff]   ;;  %v1088_v33 = vrot.slane %v1086_v26, 2  ;;  %v1849_v48 = vshll.u32 %v3284_v41, 16  ;;  %v1854_v52 = vshll.u32 %v3285_v45, 16  ;;  %v3299_v26 = vld [vmem:[%s4059_s2 + $0x70] sm:$0xff]  }
  0x36   : > { %3090 = vmatprep.mubr.msk.bf16.mxu0 %vm463_vm2, %v1030_v40  ;;  %3082 = vmatprep.mubr.msk.bf16.mxu1 %vm463_vm2, %v758_v38  ;;  %v1083_v30 = vor.u32 %v1082_v23, %v1079_v22  ;;  %v1091_v34 = vrot.slane %v1089_v27, 3  ;;  %v1349_v37 = vsel %vm1340_vm5, %v1346_v12, %v1348_v29  ;;  %v3276_v38 = vld [vmem:[#allocation2 + $0x30] sm:$0xff]   ;;  %v1351_v39 = vsel %vm1340_vm5, %v1348_v29, %v1350_v31  ;;  %v3279_v40 = vld [vmem:[#allocation2 + $0x38] sm:$0xff]  }
  0x37   : > { %v1074_v28 = vor.u32 %v1073_v14, %v1070_v13  ;;  %v1352_v44 = vrot.slane %v3276_v38, 3  ;;  %v1851_v55 = vrot.slane %v1849_v48, 1  ;;  %v1356_v57 = vrot.slane %v3280_v47, 3  ;;  %v3302_v13 = vld [vmem:[#allocation2 + $0x10] sm:$0xfc]   ;;  %v3288_v14 = vld [vmem:[#allocation2 + $0x28] sm:$0xff]  }
  0x38   : > { %v1092_v42 = vor.u32 %v1091_v34, %v1088_v33  ;;  %v1858_v5 = vshrl.u32 %v3285_v45, 16  ;;  %v1866_v7 = vshrl.u32 %v3287_v56, 16  ;;  %v2161_v23 = vshrl.u32 %v3302_v13, 16  ;;  %v3297_v29 = vld [vmem:[#allocation2 + $0x40] sm:$0xff]  }
  0x39   : > { %v1075_v35 = vsel %vm1013_vm4, %v1065_v9, %v1074_v28  ;;  %v1084_v36 = vsel %vm1013_vm4, %v1074_v28, %v1083_v30  ;;  %v1353_v51 = vsel %vm1340_vm5, %v1350_v31, %v1352_v44  ;;  %v2164_v27 = vshll.u32 %v3302_v13, 16  ;;  %v3304_v34 = vld [vmem:[#allocation2 + $0x20] sm:$0xff]  }
  0x3a   : > { %v1093_v49 = vsel %vm1013_vm4, %v1083_v30, %v1092_v42  ;;  %v3294_v30 = vld [vmem:[#allocation2 + $0x38] sm:$0xff]   ;;  %v3307_v42 = vld [vmem:[#allocation2 + $0x28] sm:$0xff]   ;;  %v1898_v48 = vshrl.u32 %v3297_v29, 16 }
  0x3d   : > { %3091 = vmatmul.mubr.msk.bf16.vlgmr.msra.gmra.mxu0 %vm463_vm2, %v1039_v54  ;;  %3083 = vmatmul.mubr.msk.bf16.gmra.mxu1 %vm463_vm2, %v766_v61  ;;  %v1847_v54 = vshrl.u32 %v3284_v41, 16  ;;  %v3290_v61 = vld [vmem:[#allocation2 + $0x28] sm:$0xff]   ;;  %v1894_v41 = vshll.u32 %v3297_v29, 16 }
  0x3e   : > { %3127 = vmatpush3.bf16.msra.mxu0 %v3261_v17  ;;  %3094 = vmatprep.mubr.msk.bf16.mxu0 %vm463_vm2, %v1048_v1  ;;  %v1066_v17 = vsel %vm1013_vm4, %v1056_v2, %v1065_v9  ;;  %v3286_v1 = vld [vmem:[#allocation2 + $0x20] sm:$0xff]   ;;  %v1862_v2 = vshll.u32 %v3287_v56, 16  ;;  %v1870_v8 = vshll.u32 %v3290_v61, 16  ;;  %v3292_v9 = vld [vmem:[#allocation2 + $0x30] sm:$0xff]   ;;  %v1874_v22 = vshrl.u32 %v3290_v61, 16 }
  0x3f   : > { %3128 = vmatprep.subr.bf16.mxu0 %v3272_v60  ;;  %3110 = vmatprep.mubr.msk.bf16.mxu1 %vm463_vm2, %v1343_v0  ;;  %v1852_v63 = vor.u32 %v1851_v55, %v1847_v54  ;;  %v344_v0 = vld [vmem:[%s3447_s12 + $0xc] sm:$0xf]  ;;  %v1878_v18 = vshll.u32 %v3292_v9, 16  ;;  %v1896_v54 = vrot.slane %v1894_v41, 1 }
  0x40   : > { %348 = vst.msk [vmem:[#allocation2 + $0x4c] sm:$0xf] %vm324_vm0, %v344_v0  ;;  %v1864_v10 = vrot.slane %v1862_v2, 1  ;;  %v1872_v16 = vrot.slane %v1870_v8, 1 }
  0x41   : > { %v1880_v28 = vrot.slane %v1878_v18, 1 }
  0x42   : > { %3129 = vmatpush3.bf16.msra.mxu0 %v3272_v60  ;;  %v1856_v60 = vrot.slane %v1854_v52, 1  ;;  %v1868_v15 = vor.u32 %v1866_v7, %v1864_v10  ;;  %v2181_v52 = vshll.u32 %v3304_v34, 16 }
  0x43   : > { %3166 = vmatprep.subr.bf16.mxu0 %v3282_v32 }
  0x44   : > { %v1857_v6 = vsel %vm698_vm3, %v1852_v63, %v1856_v60  ;;  %v1860_v12 = vor.u32 %v1858_v5, %v1856_v60  ;;  %v1900_v60 = vor.u32 %v1898_v48, %v1896_v54  ;;  %v2183_v63 = vrot.slane %v2181_v52, 3  ;;  %v3314_v52 = vld [vmem:[#allocation2 + $0x38] sm:$0xff]  }
  0x45   : > { %3095 = vmatmul.mubr.msk.bf16.gmra.mxu0 %vm463_vm2, %v1057_v11  ;;  %3111 = vmatmul.mubr.msk.bf16.vlgmr.msra.gmra.mxu1 %vm463_vm2, %v1345_v20  ;;  %v3295_v11 = vld [vmem:[#allocation2 + $0x38] sm:$0xff]  }
  0x46   : > { %3098 = vmatprep.mubr.msk.bf16.mxu0 %vm463_vm2, %v1066_v17  ;;  %3147 = vmatpush3.bf16.msra.mxu1 %v3268_v46  ;;  %v1354_v46 = vrot.slane %v3279_v40, 3  ;;  %v3291_v17 = vld [vmem:[#allocation2 + $0x30] sm:$0xff]   ;;  %v1886_v19 = vshll.u32 %v3295_v11, 16  ;;  %v3303_v20 = vld [vmem:[#allocation2 + $0x18] sm:$0xff]   ;;  %v1865_v21 = vsel %vm698_vm3, %v1860_v12, %v1864_v10  ;;  %v2166_v40 = vrot.slane %v2164_v27, 3 }
  0x47   : > { %3114 = vmatprep.mubr.msk.bf16.mxu1 %vm463_vm2, %v1347_v25  ;;  %3148 = vmatprep.subr.bf16.mxu1 %v3278_v24  ;;  %v1882_v25 = vshrl.u32 %v3292_v9, 16  ;;  %v2172_v33 = vshll.u32 %v3303_v20, 16  ;;  %v1890_v47 = vshrl.u32 %v3295_v11, 16  ;;  %v3298_v59 = vld [vmem:[#allocation2 + $0x48] sm:$0xff]   ;;  %v3305_v9 = vld [vmem:[#allocation2 + $0x10] sm:$0xf8]  }
  0x48   : > { %v1355_v53 = vsel %vm1340_vm5, %v1352_v44, %v1354_v46  ;;  %v1357_v4 = vsel %vm1340_vm5, %v1354_v46, %v1356_v57  ;;  %v1888_v31 = vrot.slane %v1886_v19, 1  ;;  %v2190_v57 = vshll.u32 %v3307_v42, 16  ;;  %v3591_v10 = vld [vmem:[#allocation2 + $0x18] sm:$0xff]   ;;  %v2782_v11 = vld [vmem:[%s4060_s3] ss:$0 sm:$0xff]  ;;  %v3315_v29 = vld [vmem:[#allocation2 + $0x48] sm:$0xff]  }
  0x49   : > { %v1884_v38 = vor.u32 %v1882_v25, %v1880_v28  ;;  %v2174_v45 = vrot.slane %v2172_v33, 3  ;;  %361 = vst.msk [vmem:[%s3584_s14 + $0x10] sm:$0xff] %vm358_vm6, %v2782_v11  ;;  %359 = vst.msk [vmem:[%s3584_s14] sm:$0xff] %vm358_vm6, %v2782_v11  ;;  %v3313_v25 = vld [vmem:[#allocation2 + $0x40] sm:$0xff]   ;;  %v3310_v33 = vld [vmem:[#allocation2 + $0x28] sm:$0xff]  }
  0x4a   : > { %3149 = vmatpush3.bf16.msra.mxu1 %v3278_v24  ;;  %v1873_v24 = vsel %vm698_vm3, %v1868_v15, %v1872_v16  ;;  %360 = vst.msk [vmem:[%s3584_s14 + $0x8] sm:$0xff] %vm358_vm6, %v2782_v11  ;;  %362 = vst.msk [vmem:[%s3584_s14 + $0x18] sm:$0xff] %vm358_vm6, %v2782_v11  ;;  %v2491_v41 = vrot.slane %v3310_v33, 3 }
  0x4b   : > { %3186 = vmatprep.subr.bf16.mxu1 %v3535_v43  ;;  %363 = vst.msk [vmem:[%s3584_s14 + $0x20] sm:$0xff] %vm358_vm6, %v2782_v11  ;;  %364 = vst.msk [vmem:[%s3584_s14 + $0x28] sm:$0xff] %vm358_vm6, %v2782_v11 }
  0x4c   : > { %365 = vst.msk [vmem:[%s3584_s14 + $0x30] sm:$0xff] %vm358_vm6, %v2782_v11  ;;  %366 = vst.msk [vmem:[%s3584_s14 + $0x38] sm:$0xff] %vm358_vm6, %v2782_v11 }
  0x4d   : > { %3099 = vmatmul.mubr.msk.bf16.gmra.mxu0 %vm463_vm2, %v1075_v35  ;;  %3115 = vmatmul.mubr.msk.bf16.gmra.mxu1 %vm463_vm2, %v1349_v37  ;;  %v1876_v35 = vor.u32 %v1874_v22, %v1872_v16  ;;  %v2163_v37 = vrot.slane %v2161_v23, 2  ;;  %367 = vst.msk [vmem:[%s3584_s14 + $0x40] sm:$0xff] %vm358_vm6, %v2782_v11  ;;  %368 = vst.msk [vmem:[%s3584_s14 + $0x48] sm:$0xff] %vm358_vm6, %v2782_v11 }
  0x4e   : > { %3102 = vmatprep.mubr.msk.bf16.mxu0 %vm463_vm2, %v1084_v36  ;;  %3118 = vmatprep.mubr.msk.bf16.mxu1 %vm463_vm2, %v1351_v39  ;;  %v3296_v36 = vld [vmem:[#allocation2 + $0x40] sm:$0xff]   ;;  %v3571_v39 = vld [vmem:[#allocation2 + $0x48] sm:$0xff]   ;;  %369 = vst.msk [vmem:[%s3584_s14 + $0x50] sm:$0xff] %vm358_vm6, %v2782_v11  ;;  %370 = vst.msk [vmem:[%s3584_s14 + $0x58] sm:$0xff] %vm358_vm6, %v2782_v11 }
  0x4f   : > { %v1881_v46 = vsel %vm698_vm3, %v1876_v35, %v1880_v28  ;;  %v2167_v55 = vor.u32 %v2166_v40, %v2163_v37  ;;  %371 = vst.msk [vmem:[%s3584_s14 + $0x60] sm:$0xff] %vm358_vm6, %v2782_v11  ;;  %372 = vst.msk [vmem:[%s3584_s14 + $0x68] sm:$0xff] %vm358_vm6, %v2782_v11  ;;  %v2214_v35 = vshrl.u32 %v3313_v25, 16 }
  0x50   : > { %373 = vst.msk [vmem:[%s3584_s14 + $0x70] sm:$0xff] %vm358_vm6, %v2782_v11  ;;  %374 = vst.msk [vmem:[%s3584_s14 + $0x78] sm:$0xff] %vm358_vm6, %v2782_v11 }
  0x55   : > { %3103 = vmatmul.mubr.msk.bf16.gmra.mxu0 %vm463_vm2, %v1093_v49  ;;  %3119 = vmatmul.mubr.msk.bf16.gmra.mxu1 %vm463_vm2, %v1353_v51  ;;  %v1902_v49 = vshll.u32 %v3571_v39, 16  ;;  %v3301_v51 = vld [vmem:[#allocation2 + $0x50] ss:$0 sps:$4 sm:$0x11]  }
  0x56   : > { %3130 = vmatprep.mubr.msk.bf16.mxu0 %vm463_vm2, %v3281_v50  ;;  %3122 = vmatprep.mubr.msk.bf16.mxu1 %vm463_vm2, %v1355_v53  ;;  %v2178_v50 = vshrl.u32 %v3304_v34, 16  ;;  %v2187_v53 = vshrl.u32 %v3307_v42, 16  ;;  %v1910_v7 = vshll.u32 %v3301_v51, 16 }
  0x57   : > { %v1904_v61 = vrot.slane %v1902_v49, 1 }
  0x58   : > { %v2180_v62 = vrot.slane %v2178_v50, 2  ;;  %v2189_v0 = vrot.slane %v2187_v53, 2  ;;  %v1912_v19 = vrot.slane %v1910_v7, 1  ;;  %v3312_v50 = vld [vmem:[#allocation2 + $0x30] sm:$0xff]  }
  0x59   : > { %v1905_v8 = vsel %vm698_vm3, %v1900_v60, %v1904_v61 }
  0x5a   : > { %v2184_v12 = vor.u32 %v2183_v63, %v2180_v62 }
  0x5d   : > { %3131 = vmatmul.mubr.msk.bf16.vlgmr.msra.gmra.mxu0 %vm463_vm2, %v3283_v58  ;;  %3123 = vmatmul.mubr.msk.bf16.gmra.mxu1 %vm463_vm2, %v1357_v4  ;;  %v1892_v58 = vor.u32 %v1890_v47, %v1888_v31  ;;  %v3311_v4 = vld [vmem:[#allocation2 + $0x38] sm:$0xff]  }
  0x5e   : > { %3167 = vmatpush3.bf16.msra.mxu0 %v3282_v32  ;;  %3134 = vmatprep.mubr.msk.bf16.mxu0 %vm463_vm2, %v3286_v1  ;;  %v2169_v32 = vshrl.u32 %v3303_v20, 16  ;;  %v3309_v1 = vld [vmem:[#allocation2 + $0x30] sm:$0xff]   ;;  %v2205_v16 = vshrl.u32 %v3311_v4, 16  ;;  %v2486_v20 = vrot.slane %v3305_v9, 3 }
  0x5f   : > { %3168 = vmatprep.subr.bf16.mxu0 %v3293_v3  ;;  %3150 = vmatprep.mubr.msk.bf16.mxu1 %vm463_vm2, %v1857_v6  ;;  %v1897_v5 = vsel %vm698_vm3, %v1892_v58, %v1896_v54  ;;  %v1906_v6 = vshrl.u32 %v3571_v39, 16  ;;  %v2196_v13 = vshrl.u32 %v3309_v1, 16  ;;  %v2226_v39 = vshll.u32 %v3315_v29, 16 }
  0x60   : > { %v2171_v44 = vrot.slane %v2169_v32, 2  ;;  %v2207_v27 = vrot.slane %v2205_v16, 2  ;;  %v2495_v58 = vrot.slane %v3314_v52, 3 }
  0x61   : > { %v1908_v18 = vor.u32 %v1906_v6, %v1904_v61  ;;  %v2198_v23 = vrot.slane %v2196_v13, 2  ;;  %v2228_v48 = vrot.slane %v2226_v39, 3 }
  0x62   : > { %3169 = vmatpush3.bf16.msra.mxu0 %v3293_v3  ;;  %v2175_v56 = vor.u32 %v2174_v45, %v2171_v44  ;;  %v2192_v3 = vrot.slane %v2190_v57, 3  ;;  %v2216_v44 = vrot.slane %v2214_v35, 2  ;;  %v2493_v57 = vrot.slane %v3312_v50, 3 }
  0x64   : > { %v2176_v2 = vsel %vm1013_vm4, %v2167_v55, %v2175_v56  ;;  %v2193_v15 = vor.u32 %v2192_v3, %v2189_v0  ;;  %v2185_v22 = vsel %vm1013_vm4, %v2175_v56, %v2184_v12  ;;  %v2494_v63 = vsel %vm1340_vm5, %v2491_v41, %v2493_v57  ;;  %v3316_v0 = vld [vmem:[#allocation2 + $0x40] sm:$0xff]  }
  0x65   : > { %3135 = vmatmul.mubr.msk.bf16.gmra.mxu0 %vm463_vm2, %v3288_v14  ;;  %3151 = vmatmul.mubr.msk.bf16.vlgmr.msra.gmra.mxu1 %vm463_vm2, %v1865_v21  ;;  %v2199_v14 = vshll.u32 %v3309_v1, 16  ;;  %v2487_v21 = vrot.slane %v3591_v10, 3  ;;  %v2496_v1 = vsel %vm1340_vm5, %v2493_v57, %v2495_v58 }
  0x66   : > { %3138 = vmatprep.mubr.msk.bf16.mxu0 %vm463_vm2, %v3291_v17  ;;  %3187 = vmatpush3.bf16.msra.mxu1 %v3535_v43  ;;  %v1889_v43 = vsel %vm698_vm3, %v1884_v38, %v1888_v31  ;;  %v2208_v17 = vshll.u32 %v3311_v4, 16  ;;  %v3308_v31 = vld [vmem:[#allocation2 + $0x20] sm:$0xff]   ;;  %v2223_v38 = vshrl.u32 %v3315_v29, 16  ;;  %v2497_v4 = vrot.slane %v3316_v0, 3 }
  0x67   : > { %3154 = vmatprep.mubr.msk.bf16.mxu1 %vm463_vm2, %v1873_v24  ;;  %3188 = vmatprep.subr.bf16.mxu1 %v3299_v26  ;;  %v2201_v24 = vrot.slane %v2199_v14, 3  ;;  %v2488_v32 = vsel %vm1340_vm5, %v2486_v20, %v2487_v21  ;;  %v2489_v40 = vrot.slane %v3308_v31, 3  ;;  %v375_v14 = vld [vmem:[%s3584_s14] sm:$0xff]  ;;  %v376_v20 = vld [vmem:[%s3584_s14 + $0x8] sm:$0xff]  ;;  %v382_v31 = vld [vmem:[%s3584_s14 + $0x38] sm:$0xff] }
  0x68   : > { %v2210_v28 = vrot.slane %v2208_v17, 3  ;;  %v2498_v7 = vsel %vm1340_vm5, %v2495_v58, %v2497_v4  ;;  %v378_v17 = vld [vmem:[%s3584_s14 + $0x18] sm:$0xff] }
  0x69   : > { %v2202_v34 = vor.u32 %v2201_v24, %v2198_v23  ;;  %v2490_v49 = vsel %vm1340_vm5, %v2487_v21, %v2489_v40  ;;  %v2492_v51 = vsel %vm1340_vm5, %v2489_v40, %v2491_v41  ;;  %v381_v23 = vld [vmem:[%s3584_s14 + $0x30] sm:$0xff] }
  0x6a   : > { %3189 = vmatpush3.bf16.msra.mxu1 %v3299_v26  ;;  %v2194_v26 = vsel %vm1013_vm4, %v2184_v12, %v2193_v15  ;;  %v2211_v37 = vor.u32 %v2210_v28, %v2207_v27  ;;  %v377_v12 = vld [vmem:[%s3584_s14 + $0x10] sm:$0xff] }
  0x6b   : > { %v2203_v42 = vsel %vm1013_vm4, %v2193_v15, %v2202_v34 }
  0x6c   : > { %v2212_v47 = vsel %vm1013_vm4, %v2202_v34, %v2211_v37 }
  0x6d   : > { %3139 = vmatmul.mubr.msk.bf16.gmra.mxu0 %vm463_vm2, %v3294_v30  ;;  %3155 = vmatmul.mubr.msk.bf16.gmra.mxu1 %vm463_vm2, %v1881_v46  ;;  %v1913_v30 = vsel %vm698_vm3, %v1908_v18, %v1912_v19  ;;  %v3317_v46 = vld [vmem:[#allocation2 + $0x50] ss:$0 sps:$4 sm:$0x77]  }
  0x6e   : > { %3142 = vmatprep.mubr.msk.bf16.mxu0 %vm463_vm2, %v3296_v36  ;;  %3158 = vmatprep.mubr.msk.bf16.mxu1 %vm463_vm2, %v1889_v43  ;;  %v2217_v36 = vshll.u32 %v3313_v25, 16  ;;  %v2225_v43 = vrot.slane %v2223_v38, 2  ;;  %v2232_v54 = vshrl.u32 %v3317_v46, 16  ;;  %v2235_v55 = vshll.u32 %v3317_v46, 16 }
  0x70   : > { %v2219_v45 = vrot.slane %v2217_v36, 3  ;;  %v2229_v56 = vor.u32 %v2228_v48, %v2225_v43  ;;  %v2234_v60 = vrot.slane %v2232_v54, 2  ;;  %v2237_v61 = vrot.slane %v2235_v55, 3  ;;  %v386_v55 = vld [vmem:[%s3584_s14 + $0x58] sm:$0xff] }
  0x72   : > { %v2220_v53 = vor.u32 %v2219_v45, %v2216_v44  ;;  %v2238_v3 = vor.u32 %v2237_v61, %v2234_v60  ;;  %v385_v44 = vld [vmem:[%s3584_s14 + $0x50] sm:$0xff]  ;;  %v384_v61 = vld [vmem:[%s3584_s14 + $0x48] sm:$0xff] }
  0x74   : > { %v2230_v62 = vsel %vm1013_vm4, %v2220_v53, %v2229_v56  ;;  %v2239_v6 = vsel %vm1013_vm4, %v2229_v56, %v2238_v3  ;;  %v389_v3 = vld [vmem:[%s3584_s14 + $0x70] sm:$0xff] }
  0x75   : > { %3143 = vmatmul.mubr.msk.bf16.gmra.mxu0 %vm463_vm2, %v3298_v59  ;;  %3159 = vmatmul.mubr.msk.bf16.gmra.mxu1 %vm463_vm2, %v1897_v5  ;;  %v2221_v59 = vsel %vm1013_vm4, %v2211_v37, %v2220_v53  ;;  %v380_v37 = vld [vmem:[%s3584_s14 + $0x28] sm:$0xff] }
  0x76   : > { %3170 = vmatprep.mubr.msk.bf16.mxu0 %vm463_vm2, %v2176_v2  ;;  %3162 = vmatprep.mubr.msk.bf16.mxu1 %vm463_vm2, %v1905_v8  ;;  %v3318_v2 = vld [vmem:[#allocation2 + $0x48] sm:$0xff]   ;;  %v3319_v8 = vld [vmem:[#allocation2 + $0x50] ss:$0 sps:$4 sm:$0x77]  }
  0x77   : > { %v2499_v5 = vrot.slane %v3318_v2, 3  ;;  %v2501_v10 = vrot.slane %v3319_v8, 3 }
  0x79   : > { %v2500_v9 = vsel %vm1340_vm5, %v2497_v4, %v2499_v5  ;;  %v2502_v11 = vsel %vm1340_vm5, %v2499_v5, %v2501_v10 }
  0x7d   : > { %3171 = vmatmul.mubr.msk.bf16.vlgmr.msra.gmra.mxu0 %vm463_vm2, %v2185_v22  ;;  %3163 = vmatmul.mubr.msk.bf16.gmra.mxu1 %vm463_vm2, %v1913_v30 }
  0x7e   : > { %3174 = vmatprep.mubr.msk.bf16.mxu0 %vm463_vm2, %v2194_v26  ;;  %3190 = vmatprep.mubr.msk.bf16.mxu1 %vm463_vm2, %v2488_v32  ;;  %v379_v26 = vld [vmem:[%s3584_s14 + $0x20] sm:$0xff] }
  0x85   : > { %3175 = vmatmul.mubr.msk.bf16.gmra.mxu0 %vm463_vm2, %v2203_v42  ;;  %3191 = vmatmul.mubr.msk.bf16.vlgmr.msra.gmra.mxu1 %vm463_vm2, %v2490_v49  ;;  %v383_v49 = vld [vmem:[%s3584_s14 + $0x40] sm:$0xff] }
  0x86   : > { %3178 = vmatprep.mubr.msk.bf16.mxu0 %vm463_vm2, %v2212_v47  ;;  %3194 = vmatprep.mubr.msk.bf16.mxu1 %vm463_vm2, %v2492_v51 }
  0x8d   : > { %3179 = vmatmul.mubr.msk.bf16.gmra.mxu0 %vm463_vm2, %v2221_v59  ;;  %3195 = vmatmul.mubr.msk.bf16.gmra.mxu1 %vm463_vm2, %v2494_v63 }
  0x8e   : > { %3182 = vmatprep.mubr.msk.bf16.mxu0 %vm463_vm2, %v2230_v62  ;;  %3198 = vmatprep.mubr.msk.bf16.mxu1 %vm463_vm2, %v2496_v1 }
  0x95   : > { %3183 = vmatmul.mubr.msk.bf16.gmra.mxu0 %vm463_vm2, %v2239_v6  ;;  %3199 = vmatmul.mubr.msk.bf16.gmra.mxu1 %vm463_vm2, %v2498_v7 }
  0x96   : > { %3202 = vmatprep.mubr.msk.bf16.mxu1 %vm463_vm2, %v2500_v9  ;;  %v387_v9 = vld [vmem:[%s3584_s14 + $0x60] sm:$0xff] }
  0x9d   : > { %3203 = vmatmul.mubr.msk.bf16.gmra.mxu1 %vm463_vm2, %v2502_v11 }
  0xdd   : > { %v3052_v13 = vpop.f32.mrf.mxu0 }
  0xde   : > { %v587_v15 = vadd.f32 %v3052_v13, %v377_v12 }
  0xdf   : > { %v522_v16 = vpop.f32.mrf.mxu0 }
  0xe0   : > { %603 = vst.msk [vmem:[%s3584_s14 + $0x10] sm:$0xff] %vm358_vm6, %v587_v15  ;;  %v585_v18 = vadd.f32 %v522_v16, %v375_v14  ;;  %v390_v15 = vld [vmem:[%s3584_s14 + $0x78] sm:$0xff] }
  0xe1   : > { %v3053_v19 = vpop.f32.mrf.mxu0 }
  0xe2   : > { %601 = vst.msk [vmem:[%s3584_s14] sm:$0xff] %vm358_vm6, %v585_v18  ;;  %v588_v21 = vadd.f32 %v3053_v19, %v378_v17 }
  0xe3   : > { %v525_v22 = vpop.f32.mrf.mxu0 }
  0xe4   : > { %604 = vst.msk [vmem:[%s3584_s14 + $0x18] sm:$0xff] %vm358_vm6, %v588_v21  ;;  %v586_v24 = vadd.f32 %v525_v22, %v376_v20  ;;  %v388_v21 = vld [vmem:[%s3584_s14 + $0x68] sm:$0xff] }
  0xe5   : > { %v3056_v25 = vpop.f32.mrf.mxu0  ;;  %v3072_v29 = vpop.f32.mrf.mxu1 }
  0xe6   : > { %602 = vst.msk [vmem:[%s3584_s14 + $0x8] sm:$0xff] %vm358_vm6, %v586_v24  ;;  %v591_v27 = vadd.f32 %v3056_v25, %v381_v23 }
  0xe7   : > { %v619_v28 = vld [vmem:[%s3584_s14 + $0x10] sm:$0xff]  ;;  %v538_v30 = vpop.f32.mrf.mxu0  ;;  %v837_v35 = vpop.f32.mrf.mxu1 }
  0xe8   : > { %v902_v32 = vadd.f32 %v3072_v29, %v619_v28  ;;  %607 = vst.msk [vmem:[%s3584_s14 + $0x30] sm:$0xff] %vm358_vm6, %v591_v27  ;;  %v589_v33 = vadd.f32 %v538_v30, %v379_v26 }
  0xe9   : > { %v617_v34 = vld [vmem:[%s3584_s14] sm:$0xff]  ;;  %v3057_v36 = vpop.f32.mrf.mxu0  ;;  %v3073_v41 = vpop.f32.mrf.mxu1 }
  0xea   : > { %918 = vst.msk [vmem:[%s3584_s14 + $0x10] sm:$0xff] %vm358_vm6, %v902_v32  ;;  %v900_v38 = vadd.f32 %v837_v35, %v617_v34  ;;  %605 = vst.msk [vmem:[%s3584_s14 + $0x20] sm:$0xff] %vm358_vm6, %v589_v33  ;;  %v592_v39 = vadd.f32 %v3057_v36, %v382_v31 }
  0xeb   : > { %v620_v40 = vld [vmem:[%s3584_s14 + $0x18] sm:$0xff]  ;;  %v541_v42 = vpop.f32.mrf.mxu0  ;;  %v840_v43 = vpop.f32.mrf.mxu1 }
  0xec   : > { %916 = vst.msk [vmem:[%s3584_s14] sm:$0xff] %vm358_vm6, %v900_v38  ;;  %v903_v45 = vadd.f32 %v3073_v41, %v620_v40  ;;  %608 = vst.msk [vmem:[%s3584_s14 + $0x38] sm:$0xff] %vm358_vm6, %v592_v39  ;;  %v590_v46 = vadd.f32 %v541_v42, %v380_v37 }
  0xed   : > { %v618_v47 = vld [vmem:[%s3584_s14 + $0x8] sm:$0xff]  ;;  %v3060_v48 = vpop.f32.mrf.mxu0  ;;  %v3076_v53 = vpop.f32.mrf.mxu1 }
  0xee   : > { %919 = vst.msk [vmem:[%s3584_s14 + $0x18] sm:$0xff] %vm358_vm6, %v903_v45  ;;  %v901_v50 = vadd.f32 %v840_v43, %v618_v47  ;;  %606 = vst.msk [vmem:[%s3584_s14 + $0x28] sm:$0xff] %vm358_vm6, %v590_v46  ;;  %v595_v51 = vadd.f32 %v3060_v48, %v385_v44 }
  0xef   : > { %v623_v52 = vld [vmem:[%s3584_s14 + $0x30] sm:$0xff]  ;;  %v554_v54 = vpop.f32.mrf.mxu0  ;;  %v853_v59 = vpop.f32.mrf.mxu1 }
  0xf0   : > { %917 = vst.msk [vmem:[%s3584_s14 + $0x8] sm:$0xff] %vm358_vm6, %v901_v50  ;;  %v906_v56 = vadd.f32 %v3076_v53, %v623_v52  ;;  %611 = vst.msk [vmem:[%s3584_s14 + $0x50] sm:$0xff] %vm358_vm6, %v595_v51  ;;  %v593_v57 = vadd.f32 %v554_v54, %v383_v49 }
  0xf1   : > { %v621_v58 = vld [vmem:[%s3584_s14 + $0x20] sm:$0xff]  ;;  %v3061_v60 = vpop.f32.mrf.mxu0  ;;  %v3077_v1 = vpop.f32.mrf.mxu1  ;;  %v934_v31 = vld [vmem:[%s3584_s14 + $0x10] sm:$0xff] }
  0xf2   : > { %922 = vst.msk [vmem:[%s3584_s14 + $0x30] sm:$0xff] %vm358_vm6, %v906_v56  ;;  %v904_v62 = vadd.f32 %v853_v59, %v621_v58  ;;  %609 = vst.msk [vmem:[%s3584_s14 + $0x40] sm:$0xff] %vm358_vm6, %v593_v57  ;;  %v596_v63 = vadd.f32 %v3061_v60, %v386_v55 }
  0xf3   : > { %v624_v0 = vld [vmem:[%s3584_s14 + $0x38] sm:$0xff]  ;;  %v557_v2 = vpop.f32.mrf.mxu0  ;;  %v856_v7 = vpop.f32.mrf.mxu1  ;;  %v932_v37 = vld [vmem:[%s3584_s14] sm:$0xff] }
  0xf4   : > { %920 = vst.msk [vmem:[%s3584_s14 + $0x20] sm:$0xff] %vm358_vm6, %v904_v62  ;;  %v907_v4 = vadd.f32 %v3077_v1, %v624_v0  ;;  %612 = vst.msk [vmem:[%s3584_s14 + $0x58] sm:$0xff] %vm358_vm6, %v596_v63  ;;  %v594_v5 = vadd.f32 %v557_v2, %v384_v61 }
  0xf5   : > { %v622_v6 = vld [vmem:[%s3584_s14 + $0x28] sm:$0xff]  ;;  %v3064_v8 = vpop.f32.mrf.mxu0  ;;  %v3080_v13 = vpop.f32.mrf.mxu1  ;;  %v935_v44 = vld [vmem:[%s3584_s14 + $0x18] sm:$0xff] }
  0xf6   : > { %923 = vst.msk [vmem:[%s3584_s14 + $0x38] sm:$0xff] %vm358_vm6, %v907_v4  ;;  %v905_v10 = vadd.f32 %v856_v7, %v622_v6  ;;  %610 = vst.msk [vmem:[%s3584_s14 + $0x48] sm:$0xff] %vm358_vm6, %v594_v5  ;;  %v599_v11 = vadd.f32 %v3064_v8, %v389_v3 }
  0xf7   : > { %v627_v12 = vld [vmem:[%s3584_s14 + $0x50] sm:$0xff]  ;;  %v570_v14 = vpop.f32.mrf.mxu0  ;;  %v869_v19 = vpop.f32.mrf.mxu1  ;;  %v933_v49 = vld [vmem:[%s3584_s14 + $0x8] sm:$0xff] }
  0xf8   : > { %921 = vst.msk [vmem:[%s3584_s14 + $0x28] sm:$0xff] %vm358_vm6, %v905_v10  ;;  %v910_v16 = vadd.f32 %v3080_v13, %v627_v12  ;;  %615 = vst.msk [vmem:[%s3584_s14 + $0x70] sm:$0xff] %vm358_vm6, %v599_v11  ;;  %v597_v17 = vadd.f32 %v570_v14, %v387_v9 }
  0xf9   : > { %v625_v18 = vld [vmem:[%s3584_s14 + $0x40] sm:$0xff]  ;;  %v3065_v20 = vpop.f32.mrf.mxu0  ;;  %v3081_v25 = vpop.f32.mrf.mxu1  ;;  %v938_v55 = vld [vmem:[%s3584_s14 + $0x30] sm:$0xff] }
  0xfa   : > { %926 = vst.msk [vmem:[%s3584_s14 + $0x50] sm:$0xff] %vm358_vm6, %v910_v16  ;;  %v908_v22 = vadd.f32 %v869_v19, %v625_v18  ;;  %613 = vst.msk [vmem:[%s3584_s14 + $0x60] sm:$0xff] %vm358_vm6, %v597_v17  ;;  %v600_v23 = vadd.f32 %v3065_v20, %v390_v15 }
  0xfb   : > { %v628_v24 = vld [vmem:[%s3584_s14 + $0x58] sm:$0xff]  ;;  %v573_v26 = vpop.f32.mrf.mxu0  ;;  %v872_v30 = vpop.f32.mrf.mxu1  ;;  %v936_v61 = vld [vmem:[%s3584_s14 + $0x20] sm:$0xff] }
  0xfc   : > { %924 = vst.msk [vmem:[%s3584_s14 + $0x40] sm:$0xff] %vm358_vm6, %v908_v22  ;;  %v911_v27 = vadd.f32 %v3081_v25, %v628_v24  ;;  %616 = vst.msk [vmem:[%s3584_s14 + $0x78] sm:$0xff] %vm358_vm6, %v600_v23  ;;  %v598_v28 = vadd.f32 %v573_v26, %v388_v21 }
  0xfd   : > { %v626_v29 = vld [vmem:[%s3584_s14 + $0x48] sm:$0xff]  ;;  %v3092_v32 = vpop.f32.mrf.mxu0  ;;  %v3084_v36 = vpop.f32.mrf.mxu1  ;;  %v939_v3 = vld [vmem:[%s3584_s14 + $0x38] sm:$0xff] }
  0xfe   : > { %927 = vst.msk [vmem:[%s3584_s14 + $0x58] sm:$0xff] %vm358_vm6, %v911_v27  ;;  %v909_v33 = vadd.f32 %v872_v30, %v626_v29  ;;  %614 = vst.msk [vmem:[%s3584_s14 + $0x68] sm:$0xff] %vm358_vm6, %v598_v28  ;;  %v1229_v34 = vadd.f32 %v3092_v32, %v934_v31 }
  0xff   : > { %v631_v35 = vld [vmem:[%s3584_s14 + $0x70] sm:$0xff]  ;;  %v1164_v38 = vpop.f32.mrf.mxu0  ;;  %v885_v42 = vpop.f32.mrf.mxu1  ;;  %v937_v9 = vld [vmem:[%s3584_s14 + $0x28] sm:$0xff] }
 0x100   : > { %925 = vst.msk [vmem:[%s3584_s14 + $0x48] sm:$0xff] %vm358_vm6, %v909_v33  ;;  %v914_v39 = vadd.f32 %v3084_v36, %v631_v35  ;;  %1245 = vst.msk [vmem:[%s3584_s14 + $0x10] sm:$0xff] %vm358_vm6, %v1229_v34  ;;  %v1227_v40 = vadd.f32 %v1164_v38, %v932_v37 }
 0x101   : > { %v629_v41 = vld [vmem:[%s3584_s14 + $0x60] sm:$0xff]  ;;  %v3093_v45 = vpop.f32.mrf.mxu0  ;;  %v3085_v48 = vpop.f32.mrf.mxu1  ;;  %v942_v15 = vld [vmem:[%s3584_s14 + $0x50] sm:$0xff] }
 0x102   : > { %930 = vst.msk [vmem:[%s3584_s14 + $0x70] sm:$0xff] %vm358_vm6, %v914_v39  ;;  %v912_v46 = vadd.f32 %v885_v42, %v629_v41  ;;  %1243 = vst.msk [vmem:[%s3584_s14] sm:$0xff] %vm358_vm6, %v1227_v40  ;;  %v1230_v47 = vadd.f32 %v3093_v45, %v935_v44 }
 0x103   : > { %v632_v43 = vld [vmem:[%s3584_s14 + $0x78] sm:$0xff]  ;;  %v1167_v50 = vpop.f32.mrf.mxu0  ;;  %v888_v54 = vpop.f32.mrf.mxu1  ;;  %v940_v21 = vld [vmem:[%s3584_s14 + $0x40] sm:$0xff] }
 0x104   : > { %928 = vst.msk [vmem:[%s3584_s14 + $0x60] sm:$0xff] %vm358_vm6, %v912_v46  ;;  %v915_v51 = vadd.f32 %v3085_v48, %v632_v43  ;;  %1246 = vst.msk [vmem:[%s3584_s14 + $0x18] sm:$0xff] %vm358_vm6, %v1230_v47  ;;  %v1228_v52 = vadd.f32 %v1167_v50, %v933_v49 }
 0x105   : > { %v630_v53 = vld [vmem:[%s3584_s14 + $0x68] sm:$0xff]  ;;  %v3096_v56 = vpop.f32.mrf.mxu0  ;;  %v3112_v60 = vpop.f32.mrf.mxu1  ;;  %v943_v27 = vld [vmem:[%s3584_s14 + $0x58] sm:$0xff] }
 0x106   : > { %931 = vst.msk [vmem:[%s3584_s14 + $0x78] sm:$0xff] %vm358_vm6, %v915_v51  ;;  %v913_v57 = vadd.f32 %v888_v54, %v630_v53  ;;  %1244 = vst.msk [vmem:[%s3584_s14 + $0x8] sm:$0xff] %vm358_vm6, %v1228_v52  ;;  %v1233_v58 = vadd.f32 %v3096_v56, %v938_v55 }
 0x107   : > { %v1261_v59 = vld [vmem:[%s3584_s14 + $0x10] sm:$0xff]  ;;  %v1180_v62 = vpop.f32.mrf.mxu0  ;;  %v1428_v2 = vpop.f32.mrf.mxu1  ;;  %v941_v33 = vld [vmem:[%s3584_s14 + $0x48] sm:$0xff] }
 0x108   : > { %929 = vst.msk [vmem:[%s3584_s14 + $0x68] sm:$0xff] %vm358_vm6, %v913_v57  ;;  %v1493_v63 = vadd.f32 %v3112_v60, %v1261_v59  ;;  %1249 = vst.msk [vmem:[%s3584_s14 + $0x30] sm:$0xff] %vm358_vm6, %v1233_v58  ;;  %v1231_v0 = vadd.f32 %v1180_v62, %v936_v61 }
 0x109   : > { %v1259_v1 = vld [vmem:[%s3584_s14] sm:$0xff]  ;;  %v3097_v4 = vpop.f32.mrf.mxu0  ;;  %v3113_v8 = vpop.f32.mrf.mxu1  ;;  %v946_v39 = vld [vmem:[%s3584_s14 + $0x70] sm:$0xff] }
 0x10a   : > { %1509 = vst.msk [vmem:[%s3584_s14 + $0x10] sm:$0xff] %vm358_vm6, %v1493_v63  ;;  %v1491_v5 = vadd.f32 %v1428_v2, %v1259_v1  ;;  %1247 = vst.msk [vmem:[%s3584_s14 + $0x20] sm:$0xff] %vm358_vm6, %v1231_v0  ;;  %v1234_v6 = vadd.f32 %v3097_v4, %v939_v3 }
 0x10b   : > { %v1262_v7 = vld [vmem:[%s3584_s14 + $0x18] sm:$0xff]  ;;  %v1183_v10 = vpop.f32.mrf.mxu0  ;;  %v1431_v14 = vpop.f32.mrf.mxu1  ;;  %v944_v46 = vld [vmem:[%s3584_s14 + $0x60] sm:$0xff] }
 0x10c   : > { %1507 = vst.msk [vmem:[%s3584_s14] sm:$0xff] %vm358_vm6, %v1491_v5  ;;  %v1494_v11 = vadd.f32 %v3113_v8, %v1262_v7  ;;  %1250 = vst.msk [vmem:[%s3584_s14 + $0x38] sm:$0xff] %vm358_vm6, %v1234_v6  ;;  %v1232_v12 = vadd.f32 %v1183_v10, %v937_v9 }
 0x10d   : > { %v1260_v13 = vld [vmem:[%s3584_s14 + $0x8] sm:$0xff]  ;;  %v3100_v16 = vpop.f32.mrf.mxu0  ;;  %v3116_v20 = vpop.f32.mrf.mxu1  ;;  %v947_v51 = vld [vmem:[%s3584_s14 + $0x78] sm:$0xff] }
 0x10e   : > { %1510 = vst.msk [vmem:[%s3584_s14 + $0x18] sm:$0xff] %vm358_vm6, %v1494_v11  ;;  %v1492_v17 = vadd.f32 %v1431_v14, %v1260_v13  ;;  %1248 = vst.msk [vmem:[%s3584_s14 + $0x28] sm:$0xff] %vm358_vm6, %v1232_v12  ;;  %v1237_v18 = vadd.f32 %v3100_v16, %v942_v15 }
 0x10f   : > { %v1265_v19 = vld [vmem:[%s3584_s14 + $0x30] sm:$0xff]  ;;  %v1196_v22 = vpop.f32.mrf.mxu0  ;;  %v1444_v26 = vpop.f32.mrf.mxu1  ;;  %v945_v57 = vld [vmem:[%s3584_s14 + $0x68] sm:$0xff] }
 0x110   : > { %1508 = vst.msk [vmem:[%s3584_s14 + $0x8] sm:$0xff] %vm358_vm6, %v1492_v17  ;;  %v1497_v23 = vadd.f32 %v3116_v20, %v1265_v19  ;;  %1253 = vst.msk [vmem:[%s3584_s14 + $0x50] sm:$0xff] %vm358_vm6, %v1237_v18  ;;  %v1235_v24 = vadd.f32 %v1196_v22, %v940_v21 }
 0x111   : > { %v1263_v25 = vld [vmem:[%s3584_s14 + $0x20] sm:$0xff]  ;;  %v3101_v28 = vpop.f32.mrf.mxu0  ;;  %v3117_v32 = vpop.f32.mrf.mxu1  ;;  %v1525_v63 = vld [vmem:[%s3584_s14 + $0x10] sm:$0xff] }
 0x112   : > { %1513 = vst.msk [vmem:[%s3584_s14 + $0x30] sm:$0xff] %vm358_vm6, %v1497_v23  ;;  %v1495_v29 = vadd.f32 %v1444_v26, %v1263_v25  ;;  %1251 = vst.msk [vmem:[%s3584_s14 + $0x40] sm:$0xff] %vm358_vm6, %v1235_v24  ;;  %v1238_v30 = vadd.f32 %v3101_v28, %v943_v27 }
 0x113   : > { %v1266_v31 = vld [vmem:[%s3584_s14 + $0x38] sm:$0xff]  ;;  %v1199_v34 = vpop.f32.mrf.mxu0  ;;  %v1447_v38 = vpop.f32.mrf.mxu1  ;;  %v1523_v5 = vld [vmem:[%s3584_s14] sm:$0xff] }
 0x114   : > { %1511 = vst.msk [vmem:[%s3584_s14 + $0x20] sm:$0xff] %vm358_vm6, %v1495_v29  ;;  %v1498_v35 = vadd.f32 %v3117_v32, %v1266_v31  ;;  %1254 = vst.msk [vmem:[%s3584_s14 + $0x58] sm:$0xff] %vm358_vm6, %v1238_v30  ;;  %v1236_v36 = vadd.f32 %v1199_v34, %v941_v33 }
 0x115   : > { %v1264_v37 = vld [vmem:[%s3584_s14 + $0x28] sm:$0xff]  ;;  %v3104_v40 = vpop.f32.mrf.mxu0  ;;  %v3120_v45 = vpop.f32.mrf.mxu1  ;;  %v1526_v11 = vld [vmem:[%s3584_s14 + $0x18] sm:$0xff] }
 0x116   : > { %1514 = vst.msk [vmem:[%s3584_s14 + $0x38] sm:$0xff] %vm358_vm6, %v1498_v35  ;;  %v1496_v41 = vadd.f32 %v1447_v38, %v1264_v37  ;;  %1252 = vst.msk [vmem:[%s3584_s14 + $0x48] sm:$0xff] %vm358_vm6, %v1236_v36  ;;  %v1241_v42 = vadd.f32 %v3104_v40, %v946_v39 }
 0x117   : > { %v1269_v44 = vld [vmem:[%s3584_s14 + $0x50] sm:$0xff]  ;;  %v1212_v47 = vpop.f32.mrf.mxu0  ;;  %v1460_v50 = vpop.f32.mrf.mxu1  ;;  %v1524_v17 = vld [vmem:[%s3584_s14 + $0x8] sm:$0xff] }
 0x118   : > { %1512 = vst.msk [vmem:[%s3584_s14 + $0x28] sm:$0xff] %vm358_vm6, %v1496_v41  ;;  %v1501_v43 = vadd.f32 %v3120_v45, %v1269_v44  ;;  %1257 = vst.msk [vmem:[%s3584_s14 + $0x70] sm:$0xff] %vm358_vm6, %v1241_v42  ;;  %v1239_v48 = vadd.f32 %v1212_v47, %v944_v46 }
 0x119   : > { %v1267_v49 = vld [vmem:[%s3584_s14 + $0x40] sm:$0xff]  ;;  %v3105_v52 = vpop.f32.mrf.mxu0  ;;  %v3121_v56 = vpop.f32.mrf.mxu1  ;;  %v1529_v23 = vld [vmem:[%s3584_s14 + $0x30] sm:$0xff] }
 0x11a   : > { %1517 = vst.msk [vmem:[%s3584_s14 + $0x50] sm:$0xff] %vm358_vm6, %v1501_v43  ;;  %v1499_v53 = vadd.f32 %v1460_v50, %v1267_v49  ;;  %1255 = vst.msk [vmem:[%s3584_s14 + $0x60] sm:$0xff] %vm358_vm6, %v1239_v48  ;;  %v1242_v54 = vadd.f32 %v3105_v52, %v947_v51 }
 0x11b   : > { %v1270_v55 = vld [vmem:[%s3584_s14 + $0x58] sm:$0xff]  ;;  %v1215_v58 = vpop.f32.mrf.mxu0  ;;  %v1463_v62 = vpop.f32.mrf.mxu1  ;;  %v1527_v29 = vld [vmem:[%s3584_s14 + $0x20] sm:$0xff] }
 0x11c   : > { %1515 = vst.msk [vmem:[%s3584_s14 + $0x40] sm:$0xff] %vm358_vm6, %v1499_v53  ;;  %v1502_v59 = vadd.f32 %v3121_v56, %v1270_v55  ;;  %1258 = vst.msk [vmem:[%s3584_s14 + $0x78] sm:$0xff] %vm358_vm6, %v1242_v54  ;;  %v1240_v60 = vadd.f32 %v1215_v58, %v945_v57 }
 0x11d   : > { %v1268_v61 = vld [vmem:[%s3584_s14 + $0x48] sm:$0xff]  ;;  %v3132_v0 = vpop.f32.mrf.mxu0  ;;  %v3124_v4 = vpop.f32.mrf.mxu1  ;;  %v1530_v35 = vld [vmem:[%s3584_s14 + $0x38] sm:$0xff] }
 0x11e   : > { %1518 = vst.msk [vmem:[%s3584_s14 + $0x58] sm:$0xff] %vm358_vm6, %v1502_v59  ;;  %v1500_v1 = vadd.f32 %v1463_v62, %v1268_v61  ;;  %1256 = vst.msk [vmem:[%s3584_s14 + $0x68] sm:$0xff] %vm358_vm6, %v1240_v60  ;;  %v1735_v2 = vadd.f32 %v3132_v0, %v1525_v63 }
 0x11f   : > { %v1273_v3 = vld [vmem:[%s3584_s14 + $0x70] sm:$0xff]  ;;  %v1670_v6 = vpop.f32.mrf.mxu0  ;;  %v1476_v10 = vpop.f32.mrf.mxu1  ;;  %v1528_v41 = vld [vmem:[%s3584_s14 + $0x28] sm:$0xff] }
 0x120   : > { %1516 = vst.msk [vmem:[%s3584_s14 + $0x48] sm:$0xff] %vm358_vm6, %v1500_v1  ;;  %v1505_v7 = vadd.f32 %v3124_v4, %v1273_v3  ;;  %1751 = vst.msk [vmem:[%s3584_s14 + $0x10] sm:$0xff] %vm358_vm6, %v1735_v2  ;;  %v1733_v8 = vadd.f32 %v1670_v6, %v1523_v5 }
 0x121   : > { %v1271_v9 = vld [vmem:[%s3584_s14 + $0x60] sm:$0xff]  ;;  %v3133_v12 = vpop.f32.mrf.mxu0  ;;  %v3125_v16 = vpop.f32.mrf.mxu1  ;;  %v1533_v43 = vld [vmem:[%s3584_s14 + $0x50] sm:$0xff] }
 0x122   : > { %1521 = vst.msk [vmem:[%s3584_s14 + $0x70] sm:$0xff] %vm358_vm6, %v1505_v7  ;;  %v1503_v13 = vadd.f32 %v1476_v10, %v1271_v9  ;;  %1749 = vst.msk [vmem:[%s3584_s14] sm:$0xff] %vm358_vm6, %v1733_v8  ;;  %v1736_v14 = vadd.f32 %v3133_v12, %v1526_v11 }
 0x123   : > { %v1274_v15 = vld [vmem:[%s3584_s14 + $0x78] sm:$0xff]  ;;  %v1673_v18 = vpop.f32.mrf.mxu0  ;;  %v1479_v22 = vpop.f32.mrf.mxu1  ;;  %v1531_v53 = vld [vmem:[%s3584_s14 + $0x40] sm:$0xff] }
 0x124   : > { %1519 = vst.msk [vmem:[%s3584_s14 + $0x60] sm:$0xff] %vm358_vm6, %v1503_v13  ;;  %v1506_v19 = vadd.f32 %v3125_v16, %v1274_v15  ;;  %1752 = vst.msk [vmem:[%s3584_s14 + $0x18] sm:$0xff] %vm358_vm6, %v1736_v14  ;;  %v1734_v20 = vadd.f32 %v1673_v18, %v1524_v17 }
 0x125   : > { %v1272_v21 = vld [vmem:[%s3584_s14 + $0x68] sm:$0xff]  ;;  %v3136_v24 = vpop.f32.mrf.mxu0  ;;  %v3152_v28 = vpop.f32.mrf.mxu1  ;;  %v1534_v59 = vld [vmem:[%s3584_s14 + $0x58] sm:$0xff] }
 0x126   : > { %1522 = vst.msk [vmem:[%s3584_s14 + $0x78] sm:$0xff] %vm358_vm6, %v1506_v19  ;;  %v1504_v25 = vadd.f32 %v1479_v22, %v1272_v21  ;;  %1750 = vst.msk [vmem:[%s3584_s14 + $0x8] sm:$0xff] %vm358_vm6, %v1734_v20  ;;  %v1739_v26 = vadd.f32 %v3136_v24, %v1529_v23 }
 0x127   : > { %v1767_v27 = vld [vmem:[%s3584_s14 + $0x10] sm:$0xff]  ;;  %v1686_v30 = vpop.f32.mrf.mxu0  ;;  %v1984_v34 = vpop.f32.mrf.mxu1  ;;  %v1532_v1 = vld [vmem:[%s3584_s14 + $0x48] sm:$0xff] }
 0x128   : > { %1520 = vst.msk [vmem:[%s3584_s14 + $0x68] sm:$0xff] %vm358_vm6, %v1504_v25  ;;  %v2049_v31 = vadd.f32 %v3152_v28, %v1767_v27  ;;  %1755 = vst.msk [vmem:[%s3584_s14 + $0x30] sm:$0xff] %vm358_vm6, %v1739_v26  ;;  %v1737_v32 = vadd.f32 %v1686_v30, %v1527_v29 }
 0x129   : > { %v1765_v33 = vld [vmem:[%s3584_s14] sm:$0xff]  ;;  %v3137_v36 = vpop.f32.mrf.mxu0  ;;  %v3153_v40 = vpop.f32.mrf.mxu1  ;;  %v1537_v7 = vld [vmem:[%s3584_s14 + $0x70] sm:$0xff] }
 0x12a   : > { %2065 = vst.msk [vmem:[%s3584_s14 + $0x10] sm:$0xff] %vm358_vm6, %v2049_v31  ;;  %v2047_v37 = vadd.f32 %v1984_v34, %v1765_v33  ;;  %1753 = vst.msk [vmem:[%s3584_s14 + $0x20] sm:$0xff] %vm358_vm6, %v1737_v32  ;;  %v1740_v38 = vadd.f32 %v3137_v36, %v1530_v35 }
 0x12b   : > { %v1768_v39 = vld [vmem:[%s3584_s14 + $0x18] sm:$0xff]  ;;  %v1689_v42 = vpop.f32.mrf.mxu0  ;;  %v1987_v47 = vpop.f32.mrf.mxu1  ;;  %v1535_v13 = vld [vmem:[%s3584_s14 + $0x60] sm:$0xff] }
 0x12c   : > { %2063 = vst.msk [vmem:[%s3584_s14] sm:$0xff] %vm358_vm6, %v2047_v37  ;;  %v2050_v44 = vadd.f32 %v3153_v40, %v1768_v39  ;;  %1756 = vst.msk [vmem:[%s3584_s14 + $0x38] sm:$0xff] %vm358_vm6, %v1740_v38  ;;  %v1738_v45 = vadd.f32 %v1689_v42, %v1528_v41 }
 0x12d   : > { %v1766_v46 = vld [vmem:[%s3584_s14 + $0x8] sm:$0xff]  ;;  %v3140_v48 = vpop.f32.mrf.mxu0  ;;  %v3156_v52 = vpop.f32.mrf.mxu1  ;;  %v1538_v19 = vld [vmem:[%s3584_s14 + $0x78] sm:$0xff] }
 0x12e   : > { %2066 = vst.msk [vmem:[%s3584_s14 + $0x18] sm:$0xff] %vm358_vm6, %v2050_v44  ;;  %v2048_v49 = vadd.f32 %v1987_v47, %v1766_v46  ;;  %1754 = vst.msk [vmem:[%s3584_s14 + $0x28] sm:$0xff] %vm358_vm6, %v1738_v45  ;;  %v1743_v50 = vadd.f32 %v3140_v48, %v1533_v43 }
 0x12f   : > { %v1771_v51 = vld [vmem:[%s3584_s14 + $0x30] sm:$0xff]  ;;  %v1702_v54 = vpop.f32.mrf.mxu0  ;;  %v2000_v58 = vpop.f32.mrf.mxu1  ;;  %v1536_v25 = vld [vmem:[%s3584_s14 + $0x68] sm:$0xff] }
 0x130   : > { %2064 = vst.msk [vmem:[%s3584_s14 + $0x8] sm:$0xff] %vm358_vm6, %v2048_v49  ;;  %v2053_v55 = vadd.f32 %v3156_v52, %v1771_v51  ;;  %1759 = vst.msk [vmem:[%s3584_s14 + $0x50] sm:$0xff] %vm358_vm6, %v1743_v50  ;;  %v1741_v56 = vadd.f32 %v1702_v54, %v1531_v53 }
 0x131   : > { %v1769_v57 = vld [vmem:[%s3584_s14 + $0x20] sm:$0xff]  ;;  %v3141_v60 = vpop.f32.mrf.mxu0  ;;  %v3157_v0 = vpop.f32.mrf.mxu1  ;;  %v2081_v31 = vld [vmem:[%s3584_s14 + $0x10] sm:$0xff] }
 0x132   : > { %2069 = vst.msk [vmem:[%s3584_s14 + $0x30] sm:$0xff] %vm358_vm6, %v2053_v55  ;;  %v2051_v61 = vadd.f32 %v2000_v58, %v1769_v57  ;;  %1757 = vst.msk [vmem:[%s3584_s14 + $0x40] sm:$0xff] %vm358_vm6, %v1741_v56  ;;  %v1744_v62 = vadd.f32 %v3141_v60, %v1534_v59 }
 0x133   : > { %v1772_v63 = vld [vmem:[%s3584_s14 + $0x38] sm:$0xff]  ;;  %v1705_v2 = vpop.f32.mrf.mxu0  ;;  %v2003_v6 = vpop.f32.mrf.mxu1  ;;  %v2079_v37 = vld [vmem:[%s3584_s14] sm:$0xff] }
 0x134   : > { %2067 = vst.msk [vmem:[%s3584_s14 + $0x20] sm:$0xff] %vm358_vm6, %v2051_v61  ;;  %v2054_v3 = vadd.f32 %v3157_v0, %v1772_v63  ;;  %1760 = vst.msk [vmem:[%s3584_s14 + $0x58] sm:$0xff] %vm358_vm6, %v1744_v62  ;;  %v1742_v4 = vadd.f32 %v1705_v2, %v1532_v1 }
 0x135   : > { %v1770_v5 = vld [vmem:[%s3584_s14 + $0x28] sm:$0xff]  ;;  %v3144_v8 = vpop.f32.mrf.mxu0  ;;  %v3160_v12 = vpop.f32.mrf.mxu1  ;;  %v2082_v44 = vld [vmem:[%s3584_s14 + $0x18] sm:$0xff] }
 0x136   : > { %2070 = vst.msk [vmem:[%s3584_s14 + $0x38] sm:$0xff] %vm358_vm6, %v2054_v3  ;;  %v2052_v9 = vadd.f32 %v2003_v6, %v1770_v5  ;;  %1758 = vst.msk [vmem:[%s3584_s14 + $0x48] sm:$0xff] %vm358_vm6, %v1742_v4  ;;  %v1747_v10 = vadd.f32 %v3144_v8, %v1537_v7 }
 0x137   : > { %v1775_v11 = vld [vmem:[%s3584_s14 + $0x50] sm:$0xff]  ;;  %v1718_v14 = vpop.f32.mrf.mxu0  ;;  %v2016_v18 = vpop.f32.mrf.mxu1  ;;  %v2080_v49 = vld [vmem:[%s3584_s14 + $0x8] sm:$0xff] }
 0x138   : > { %2068 = vst.msk [vmem:[%s3584_s14 + $0x28] sm:$0xff] %vm358_vm6, %v2052_v9  ;;  %v2057_v15 = vadd.f32 %v3160_v12, %v1775_v11  ;;  %1763 = vst.msk [vmem:[%s3584_s14 + $0x70] sm:$0xff] %vm358_vm6, %v1747_v10  ;;  %v1745_v16 = vadd.f32 %v1718_v14, %v1535_v13 }
 0x139   : > { %v1773_v17 = vld [vmem:[%s3584_s14 + $0x40] sm:$0xff]  ;;  %v3145_v20 = vpop.f32.mrf.mxu0  ;;  %v3161_v24 = vpop.f32.mrf.mxu1  ;;  %v2085_v55 = vld [vmem:[%s3584_s14 + $0x30] sm:$0xff] }
 0x13a   : > { %2073 = vst.msk [vmem:[%s3584_s14 + $0x50] sm:$0xff] %vm358_vm6, %v2057_v15  ;;  %v2055_v21 = vadd.f32 %v2016_v18, %v1773_v17  ;;  %1761 = vst.msk [vmem:[%s3584_s14 + $0x60] sm:$0xff] %vm358_vm6, %v1745_v16  ;;  %v1748_v22 = vadd.f32 %v3145_v20, %v1538_v19 }
 0x13b   : > { %v1776_v23 = vld [vmem:[%s3584_s14 + $0x58] sm:$0xff]  ;;  %v1721_v26 = vpop.f32.mrf.mxu0  ;;  %v2019_v30 = vpop.f32.mrf.mxu1  ;;  %v2083_v61 = vld [vmem:[%s3584_s14 + $0x20] sm:$0xff] }
 0x13c   : > { %2071 = vst.msk [vmem:[%s3584_s14 + $0x40] sm:$0xff] %vm358_vm6, %v2055_v21  ;;  %v2058_v27 = vadd.f32 %v3161_v24, %v1776_v23  ;;  %1764 = vst.msk [vmem:[%s3584_s14 + $0x78] sm:$0xff] %vm358_vm6, %v1748_v22  ;;  %v1746_v28 = vadd.f32 %v1721_v26, %v1536_v25 }
 0x13d   : > { %v1774_v29 = vld [vmem:[%s3584_s14 + $0x48] sm:$0xff]  ;;  %v3172_v32 = vpop.f32.mrf.mxu0  ;;  %v3164_v36 = vpop.f32.mrf.mxu1  ;;  %v2086_v3 = vld [vmem:[%s3584_s14 + $0x38] sm:$0xff] }
 0x13e   : > { %2074 = vst.msk [vmem:[%s3584_s14 + $0x58] sm:$0xff] %vm358_vm6, %v2058_v27  ;;  %v2056_v33 = vadd.f32 %v2019_v30, %v1774_v29  ;;  %1762 = vst.msk [vmem:[%s3584_s14 + $0x68] sm:$0xff] %vm358_vm6, %v1746_v28  ;;  %v2375_v34 = vadd.f32 %v3172_v32, %v2081_v31 }
 0x13f   : > { %v1779_v35 = vld [vmem:[%s3584_s14 + $0x70] sm:$0xff]  ;;  %v2310_v38 = vpop.f32.mrf.mxu0  ;;  %v2032_v42 = vpop.f32.mrf.mxu1  ;;  %v2084_v9 = vld [vmem:[%s3584_s14 + $0x28] sm:$0xff] }
 0x140   : > { %2072 = vst.msk [vmem:[%s3584_s14 + $0x48] sm:$0xff] %vm358_vm6, %v2056_v33  ;;  %v2061_v39 = vadd.f32 %v3164_v36, %v1779_v35  ;;  %2391 = vst.msk [vmem:[%s3584_s14 + $0x10] sm:$0xff] %vm358_vm6, %v2375_v34  ;;  %v2373_v40 = vadd.f32 %v2310_v38, %v2079_v37 }
 0x141   : > { %v1777_v41 = vld [vmem:[%s3584_s14 + $0x60] sm:$0xff]  ;;  %v3173_v45 = vpop.f32.mrf.mxu0  ;;  %v3165_v48 = vpop.f32.mrf.mxu1  ;;  %v2089_v15 = vld [vmem:[%s3584_s14 + $0x50] sm:$0xff] }
 0x142   : > { %2077 = vst.msk [vmem:[%s3584_s14 + $0x70] sm:$0xff] %vm358_vm6, %v2061_v39  ;;  %v2059_v46 = vadd.f32 %v2032_v42, %v1777_v41  ;;  %2389 = vst.msk [vmem:[%s3584_s14] sm:$0xff] %vm358_vm6, %v2373_v40  ;;  %v2376_v47 = vadd.f32 %v3173_v45, %v2082_v44 }
 0x143   : > { %v1780_v43 = vld [vmem:[%s3584_s14 + $0x78] sm:$0xff]  ;;  %v2313_v50 = vpop.f32.mrf.mxu0  ;;  %v2035_v54 = vpop.f32.mrf.mxu1  ;;  %v2087_v21 = vld [vmem:[%s3584_s14 + $0x40] sm:$0xff] }
 0x144   : > { %2075 = vst.msk [vmem:[%s3584_s14 + $0x60] sm:$0xff] %vm358_vm6, %v2059_v46  ;;  %v2062_v51 = vadd.f32 %v3165_v48, %v1780_v43  ;;  %2392 = vst.msk [vmem:[%s3584_s14 + $0x18] sm:$0xff] %vm358_vm6, %v2376_v47  ;;  %v2374_v52 = vadd.f32 %v2313_v50, %v2080_v49 }
 0x145   : > { %v1778_v53 = vld [vmem:[%s3584_s14 + $0x68] sm:$0xff]  ;;  %v3176_v56 = vpop.f32.mrf.mxu0  ;;  %v3192_v60 = vpop.f32.mrf.mxu1  ;;  %v2090_v27 = vld [vmem:[%s3584_s14 + $0x58] sm:$0xff] }
 0x146   : > { %2078 = vst.msk [vmem:[%s3584_s14 + $0x78] sm:$0xff] %vm358_vm6, %v2062_v51  ;;  %v2060_v57 = vadd.f32 %v2035_v54, %v1778_v53  ;;  %2390 = vst.msk [vmem:[%s3584_s14 + $0x8] sm:$0xff] %vm358_vm6, %v2374_v52  ;;  %v2379_v58 = vadd.f32 %v3176_v56, %v2085_v55 }
 0x147   : > { %v2407_v59 = vld [vmem:[%s3584_s14 + $0x10] sm:$0xff]  ;;  %v2326_v62 = vpop.f32.mrf.mxu0  ;;  %v2573_v2 = vpop.f32.mrf.mxu1  ;;  %v2088_v33 = vld [vmem:[%s3584_s14 + $0x48] sm:$0xff] }
 0x148   : > { %2076 = vst.msk [vmem:[%s3584_s14 + $0x68] sm:$0xff] %vm358_vm6, %v2060_v57  ;;  %v2638_v63 = vadd.f32 %v3192_v60, %v2407_v59  ;;  %2395 = vst.msk [vmem:[%s3584_s14 + $0x30] sm:$0xff] %vm358_vm6, %v2379_v58  ;;  %v2377_v0 = vadd.f32 %v2326_v62, %v2083_v61 }
 0x149   : > { %v2405_v1 = vld [vmem:[%s3584_s14] sm:$0xff]  ;;  %v3177_v4 = vpop.f32.mrf.mxu0  ;;  %v3193_v8 = vpop.f32.mrf.mxu1  ;;  %v2093_v39 = vld [vmem:[%s3584_s14 + $0x70] sm:$0xff] }
 0x14a   : > { %2654 = vst.msk [vmem:[%s3584_s14 + $0x10] sm:$0xff] %vm358_vm6, %v2638_v63  ;;  %v2636_v5 = vadd.f32 %v2573_v2, %v2405_v1  ;;  %2393 = vst.msk [vmem:[%s3584_s14 + $0x20] sm:$0xff] %vm358_vm6, %v2377_v0  ;;  %v2380_v6 = vadd.f32 %v3177_v4, %v2086_v3 }
 0x14b   : > { %v2408_v7 = vld [vmem:[%s3584_s14 + $0x18] sm:$0xff]  ;;  %v2329_v10 = vpop.f32.mrf.mxu0  ;;  %v2576_v14 = vpop.f32.mrf.mxu1  ;;  %v2091_v46 = vld [vmem:[%s3584_s14 + $0x60] sm:$0xff] }
 0x14c   : > { %2652 = vst.msk [vmem:[%s3584_s14] sm:$0xff] %vm358_vm6, %v2636_v5  ;;  %v2639_v11 = vadd.f32 %v3193_v8, %v2408_v7  ;;  %2396 = vst.msk [vmem:[%s3584_s14 + $0x38] sm:$0xff] %vm358_vm6, %v2380_v6  ;;  %v2378_v12 = vadd.f32 %v2329_v10, %v2084_v9 }
 0x14d   : > { %v2406_v13 = vld [vmem:[%s3584_s14 + $0x8] sm:$0xff]  ;;  %v3180_v16 = vpop.f32.mrf.mxu0  ;;  %v3196_v20 = vpop.f32.mrf.mxu1  ;;  %v2094_v51 = vld [vmem:[%s3584_s14 + $0x78] sm:$0xff] }
 0x14e   : > { %2655 = vst.msk [vmem:[%s3584_s14 + $0x18] sm:$0xff] %vm358_vm6, %v2639_v11  ;;  %v2637_v17 = vadd.f32 %v2576_v14, %v2406_v13  ;;  %2394 = vst.msk [vmem:[%s3584_s14 + $0x28] sm:$0xff] %vm358_vm6, %v2378_v12  ;;  %v2383_v18 = vadd.f32 %v3180_v16, %v2089_v15 }
 0x14f   : > { %v2411_v19 = vld [vmem:[%s3584_s14 + $0x30] sm:$0xff]  ;;  %v2342_v22 = vpop.f32.mrf.mxu0  ;;  %v2589_v26 = vpop.f32.mrf.mxu1  ;;  %v2092_v57 = vld [vmem:[%s3584_s14 + $0x68] sm:$0xff] }
 0x150   : > { %2653 = vst.msk [vmem:[%s3584_s14 + $0x8] sm:$0xff] %vm358_vm6, %v2637_v17  ;;  %v2642_v23 = vadd.f32 %v3196_v20, %v2411_v19  ;;  %2399 = vst.msk [vmem:[%s3584_s14 + $0x50] sm:$0xff] %vm358_vm6, %v2383_v18  ;;  %v2381_v24 = vadd.f32 %v2342_v22, %v2087_v21 }
 0x151   : > { %v2409_v25 = vld [vmem:[%s3584_s14 + $0x20] sm:$0xff]  ;;  %v3181_v28 = vpop.f32.mrf.mxu0  ;;  %v3197_v32 = vpop.f32.mrf.mxu1 }
 0x152   : > { %2658 = vst.msk [vmem:[%s3584_s14 + $0x30] sm:$0xff] %vm358_vm6, %v2642_v23  ;;  %v2640_v29 = vadd.f32 %v2589_v26, %v2409_v25  ;;  %2397 = vst.msk [vmem:[%s3584_s14 + $0x40] sm:$0xff] %vm358_vm6, %v2381_v24  ;;  %v2384_v30 = vadd.f32 %v3181_v28, %v2090_v27 }
 0x153   : > { %v2412_v31 = vld [vmem:[%s3584_s14 + $0x38] sm:$0xff]  ;;  %v2345_v34 = vpop.f32.mrf.mxu0  ;;  %v2592_v38 = vpop.f32.mrf.mxu1 }
 0x154   : > { %2656 = vst.msk [vmem:[%s3584_s14 + $0x20] sm:$0xff] %vm358_vm6, %v2640_v29  ;;  %v2643_v35 = vadd.f32 %v3197_v32, %v2412_v31  ;;  %2400 = vst.msk [vmem:[%s3584_s14 + $0x58] sm:$0xff] %vm358_vm6, %v2384_v30  ;;  %v2382_v36 = vadd.f32 %v2345_v34, %v2088_v33 }
 0x155   : > { %v2410_v37 = vld [vmem:[%s3584_s14 + $0x28] sm:$0xff]  ;;  %v3184_v40 = vpop.f32.mrf.mxu0  ;;  %v3200_v45 = vpop.f32.mrf.mxu1 }
 0x156   : > { %2659 = vst.msk [vmem:[%s3584_s14 + $0x38] sm:$0xff] %vm358_vm6, %v2643_v35  ;;  %v2641_v41 = vadd.f32 %v2592_v38, %v2410_v37  ;;  %2398 = vst.msk [vmem:[%s3584_s14 + $0x48] sm:$0xff] %vm358_vm6, %v2382_v36  ;;  %v2387_v42 = vadd.f32 %v3184_v40, %v2093_v39 }
 0x157   : > { %v2415_v44 = vld [vmem:[%s3584_s14 + $0x50] sm:$0xff]  ;;  %v2358_v47 = vpop.f32.mrf.mxu0  ;;  %v2605_v50 = vpop.f32.mrf.mxu1 }
 0x158   : > { %2657 = vst.msk [vmem:[%s3584_s14 + $0x28] sm:$0xff] %vm358_vm6, %v2641_v41  ;;  %v2646_v43 = vadd.f32 %v3200_v45, %v2415_v44  ;;  %2403 = vst.msk [vmem:[%s3584_s14 + $0x70] sm:$0xff] %vm358_vm6, %v2387_v42  ;;  %v2385_v48 = vadd.f32 %v2358_v47, %v2091_v46 }
 0x159   : > { %v2413_v49 = vld [vmem:[%s3584_s14 + $0x40] sm:$0xff]  ;;  %v3185_v52 = vpop.f32.mrf.mxu0  ;;  %v3201_v56 = vpop.f32.mrf.mxu1 }
 0x15a   : > { %2662 = vst.msk [vmem:[%s3584_s14 + $0x50] sm:$0xff] %vm358_vm6, %v2646_v43  ;;  %v2644_v53 = vadd.f32 %v2605_v50, %v2413_v49  ;;  %2401 = vst.msk [vmem:[%s3584_s14 + $0x60] sm:$0xff] %vm358_vm6, %v2385_v48  ;;  %v2388_v54 = vadd.f32 %v3185_v52, %v2094_v51 }
 0x15b   : > { %v2416_v55 = vld [vmem:[%s3584_s14 + $0x58] sm:$0xff]  ;;  %v2361_v58 = vpop.f32.mrf.mxu0  ;;  %v2608_v62 = vpop.f32.mrf.mxu1 }
 0x15c   : > { %2660 = vst.msk [vmem:[%s3584_s14 + $0x40] sm:$0xff] %vm358_vm6, %v2644_v53  ;;  %v2647_v59 = vadd.f32 %v3201_v56, %v2416_v55  ;;  %2404 = vst.msk [vmem:[%s3584_s14 + $0x78] sm:$0xff] %vm358_vm6, %v2388_v54  ;;  %v2386_v60 = vadd.f32 %v2361_v58, %v2092_v57 }
 0x15d   : > { %v2414_v61 = vld [vmem:[%s3584_s14 + $0x48] sm:$0xff]  ;;  %v3204_v1 = vpop.f32.mrf.mxu1 }
 0x15e   : > { %2663 = vst.msk [vmem:[%s3584_s14 + $0x58] sm:$0xff] %vm358_vm6, %v2647_v59  ;;  %v2645_v63 = vadd.f32 %v2608_v62, %v2414_v61  ;;  %2402 = vst.msk [vmem:[%s3584_s14 + $0x68] sm:$0xff] %vm358_vm6, %v2386_v60 }
 0x15f   : > { %v2419_v0 = vld [vmem:[%s3584_s14 + $0x70] sm:$0xff]  ;;  %v2621_v4 = vpop.f32.mrf.mxu1 }
 0x160   : > { %2661 = vst.msk [vmem:[%s3584_s14 + $0x48] sm:$0xff] %vm358_vm6, %v2645_v63  ;;  %v2650_v2 = vadd.f32 %v3204_v1, %v2419_v0 }
 0x161   : > { %v2417_v3 = vld [vmem:[%s3584_s14 + $0x60] sm:$0xff]  ;;  %v3205_v7 = vpop.f32.mrf.mxu1 }
 0x162   : > { %2666 = vst.msk [vmem:[%s3584_s14 + $0x70] sm:$0xff] %vm358_vm6, %v2650_v2  ;;  %v2648_v5 = vadd.f32 %v2621_v4, %v2417_v3 }
 0x163   : > { %v2420_v6 = vld [vmem:[%s3584_s14 + $0x78] sm:$0xff]  ;;  %v2624_v10 = vpop.f32.mrf.mxu1 }
 0x164   : > { %2664 = vst.msk [vmem:[%s3584_s14 + $0x60] sm:$0xff] %vm358_vm6, %v2648_v5  ;;  %v2651_v8 = vadd.f32 %v3205_v7, %v2420_v6 }
 0x165   : > { %v2418_v9 = vld [vmem:[%s3584_s14 + $0x68] sm:$0xff] }
 0x166   : > { %2667 = vst.msk [vmem:[%s3584_s14 + $0x78] sm:$0xff] %vm358_vm6, %v2651_v8  ;;  %v2649_v11 = vadd.f32 %v2624_v10, %v2418_v9 }
 0x168   : > { %2665 = vst.msk [vmem:[%s3584_s14 + $0x68] sm:$0xff] %vm358_vm6, %v2649_v11 }
 0x169 PF: > { %s14_s17 = sadd.s32 1, %s3342_s17   ;;  %s4062_s15 = smov %s3338_s16 }
 0x16a   : > { %p11_p5 = scmp.ge.s32.totalorder %s14_s17, 4   ;;  %s4063_s16 = smov %s4065_s18 }
 0x16c   :  { %13 = sbr.rel (!%p11_p5) target bundleno = 2 (0x2), region = 76 }

</bundles_post_ra>
